<compile_context>
chip_gen: v7x
topology: tpu7x:2x2x1
jax: 0.10.0
libtpu: 0.0.40
codegen_flags: <defaults>
</compile_context>

<pallas_src>
import functools
import math

import jax
import jax.numpy as jnp
import numpy as np
from jax.experimental import pallas as pl
from jax.experimental.pallas import tpu as pltpu


# ----------------------------- Pallas kernels --------------------------------

def gcn_align_batched_kernel(a_ref, x_ref, w_ref, b_ref, o_ref, *, n_layers: int):
    """Single-invocation path (v5e/v6e): both graphs in one step, W-matmul batched over G*NP."""
    gp, npad, d = x_ref.shape                                  # (G, NP, D)

    x = x_ref[...].astype(jnp.float32)                         # bf16 -> f32 for exact normalize
    # F.normalize(x, p=2, dim=1): x / max(||x||, 1e-12) == x * rsqrt(max(sumsq, 1e-24)).
    # Clamp is on sumsq instead of the norm; they only differ for near-zero rows, which here
    # are exactly the zero padding rows -> benign. rsqrt lowers to the EUP (its own VLIW slot).
    sumsq = jnp.sum(x * x, axis=-1, keepdims=True)
    xb = (x * jax.lax.rsqrt(jnp.maximum(sumsq, 1e-24))).astype(jnp.bfloat16)

    a = a_ref[...]                                             # (G, NP, NP) bf16 (pre-cast on host)
    b = b_ref[...]                                             # (L, D) f32 (tiny, added in f32)

    for layer in range(n_layers):                              # static unroll (n_layers small)
        # per-graph message passing as batched dense SpMM: bf16 operands, f32 accumulation
        h = jnp.einsum("gij,gjd->gid", a, xb,
                       preferred_element_type=jnp.float32)     # (G, NP, D) f32
        # one conv-weight matmul for BOTH graphs: (G*NP, D)@(D, D) fills the 256-wide MXU
        h2 = jnp.dot(h.reshape(gp * npad, d).astype(jnp.bfloat16), w_ref[layer],
                     preferred_element_type=jnp.float32) + b[layer:layer + 1]
        # ReLU in f32 (v5e-safe), downcast fused with the activation; carry bf16 between layers
        xb = jnp.maximum(h2, 0.0).astype(jnp.bfloat16).reshape(gp, npad, d)

    o_ref[...] = xb.astype(o_ref.dtype)


def gcn_align_sharded_kernel(a_ref, x_ref, w_ref, b_ref, o_ref, *, n_layers: int):
    """Per-graph path (v7x): one graph per grid step, graph axis sharded across TensorCores."""
    x = x_ref[0].astype(jnp.float32)                           # (NP, D)
    sumsq = jnp.sum(x * x, axis=1, keepdims=True)
    xb = (x * jax.lax.rsqrt(jnp.maximum(sumsq, 1e-24))).astype(jnp.bfloat16)

    a = a_ref[0]                                               # (NP, NP) bf16
    b = b_ref[...]                                             # (L, D) f32

    for layer in range(n_layers):
        h = jnp.dot(a, xb, preferred_element_type=jnp.float32)                 # (NP, D) f32
        h = jnp.dot(h.astype(jnp.bfloat16), w_ref[layer],
                    preferred_element_type=jnp.float32) + b[layer:layer + 1]    # (NP, D) f32
        xb = jnp.maximum(h, 0.0).astype(jnp.bfloat16)

    o_ref[0] = xb.astype(o_ref.dtype)


def gcn_align_forward(adj, node_emb, weights, biases, *, n_layers: int, tc_sharded: bool):
    """adj: (G,NP,NP) bf16, node_emb: (G,NP,D) bf16, weights: (L,D,D) bf16, biases: (L,D) f32."""
    g, n, _ = adj.shape
    _, _, d = node_emb.shape
    l = weights.shape[0]

    flops = 2 * g * n_layers * (n * n * d + n * d * d)
    bytes_accessed = 2 * (adj.size + node_emb.size + weights.size + g * n * d) + 4 * biases.size
    cost = pl.CostEstimate(flops=flops, transcendentals=g * n, bytes_accessed=bytes_accessed)

    if tc_sharded:
        # v7x: 2 TensorCores per chip -> one graph per core.
        return pl.pallas_call(
            functools.partial(gcn_align_sharded_kernel, n_layers=n_layers),
            out_shape=jax.ShapeDtypeStruct((g, n, d), jnp.bfloat16),
            grid=(g,),
            in_specs=[
                pl.BlockSpec((1, n, n), lambda i: (i, 0, 0)),   # per-graph adjacency (bf16)
                pl.BlockSpec((1, n, d), lambda i: (i, 0, 0)),   # per-graph node embeddings (bf16)
                pl.BlockSpec((l, d, d), lambda i: (0, 0, 0)),   # shared conv weights (bf16)
                pl.BlockSpec((l, d), lambda i: (0, 0)),         # shared biases (f32)
            ],
            out_specs=pl.BlockSpec((1, n, d), lambda i: (i, 0, 0)),
            compiler_params=pltpu.CompilerParams(
                dimension_semantics=("parallel",)),
            cost_estimate=cost,
        )(adj, node_emb, weights, biases)

    # v5e/v6e (single TC): collapse the grid to one step; batch the W matmul across graphs.
    return pl.pallas_call(
        functools.partial(gcn_align_batched_kernel, n_layers=n_layers),
        out_shape=jax.ShapeDtypeStruct((g, n, d), jnp.bfloat16),
        grid=(1,),
        in_specs=[
            pl.BlockSpec((g, n, n), lambda i: (0, 0, 0)),
            pl.BlockSpec((g, n, d), lambda i: (0, 0, 0)),
            pl.BlockSpec((l, d, d), lambda i: (0, 0, 0)),
            pl.BlockSpec((l, d), lambda i: (0, 0)),
        ],
        out_specs=pl.BlockSpec((g, n, d), lambda i: (0, 0, 0)),
        compiler_params=pltpu.CompilerParams(
            dimension_semantics=("arbitrary",)),
        cost_estimate=cost,
    )(adj, node_emb, weights, biases)


def _use_tc_sharded_path() -> bool:
    """True on chips with 2 TensorCores (v7x) -> shard the graph axis across cores.
    Single-TC chips (v5e/v6e) use the collapsed single-step kernel instead."""
    try:
        kind = jax.devices()[0].device_kind.lower()
    except Exception:  # pragma: no cover - detection failure falls back to the portable path
        return False
    return ("v7" in kind) or ("tpu7" in kind)


# ------------------------------- glue (setup) --------------------------------

def build_dense_adjacency(edge_tensor: np.ndarray, num_nodes: int) -> np.ndarray:
    """Replicates: unique(edges, dim=1) -> inverse-in-degree edge weights -> scatter-add.

    edge_tensor: (2, E) int array of (source, target) pairs.
    Returns dense A (numpy, f32) with A[target, source] = 1 / in_degree(target).
    """
    # TODO(synk): edge-list gather/scatter-add (torch.index_select / index_add) has no clean
    # Pallas TPU equivalent; it is materialized as a dense adjacency here (host glue), and
    # the kernel performs the equivalent dense SpMM.
    edges = np.unique(edge_tensor.T, axis=0)                  # dedup edge columns
    src, tgt = edges[:, 0], edges[:, 1]
    in_deg = np.zeros((num_nodes,), dtype=np.float64)
    np.add.at(in_deg, tgt, 1.0)
    edge_w = 1.0 / in_deg[tgt]                                # inverse in-degree per edge
    a = np.zeros((num_nodes, num_nodes), dtype=np.float32)
    np.add.at(a, (tgt, src), edge_w.astype(np.float32))
    return a


def pad2d(a: np.ndarray, rows: int, cols: int) -> np.ndarray:
    out = np.zeros((rows, cols), dtype=a.dtype)
    out[: a.shape[0], : a.shape[1]] = a
    return out


def xavier_uniform(key, shape):
    fan_in, fan_out = shape[-2], shape[-1]
    limit = math.sqrt(6.0 / (fan_in + fan_out))
    return jax.random.uniform(key, shape, jnp.float32, -limit, limit)


def truncated_normal(key, shape, std):
    return std * jax.random.truncated_normal(key, -2.0, 2.0, shape, jnp.float32)


def gcn_align_reference(adj, x, weights, biases, n_layers):
    """Pure-JAX f32 reference of the PyTorch forward (per graph, unpadded)."""
    norm = jnp.sqrt(jnp.sum(x * x, axis=1, keepdims=True))
    x = x / jnp.maximum(norm, 1e-12)
    for layer in range(n_layers):
        h = adj @ x
        h = h @ weights[layer] + biases[layer][None, :]
        x = jnp.maximum(h, 0.0)
    return x


# ---------------------------------- main --------------------------------------

if __name__ == "__main__":
    # Small synthetic configuration (module defaults: n_layers=2, use_conv_weights=True,
    # vertical_sharing=False, inverse-in-degree edge weights, node_embedding_init='total').
    NUM_MATCH_NODES = 64
    NUM_REF_NODES = 96
    NP = 128                      # common padded node count (MXU/sublane friendly)
    EMBEDDING_DIM = 128
    N_LAYERS = 2
    NUM_EDGES = 256

    key = jax.random.PRNGKey(0)
    k_e1, k_e2, k_emb1, k_emb2, k_w0, k_w1 = jax.random.split(key, 6)

    # random edge lists (2, E): row 0 = source, row 1 = target
    match_edges = np.asarray(
        jax.random.randint(k_e1, (2, NUM_EDGES), 0, NUM_MATCH_NODES), dtype=np.int64)
    ref_edges = np.asarray(
        jax.random.randint(k_e2, (2, NUM_EDGES), 0, NUM_REF_NODES), dtype=np.int64)

    match_adj_np = build_dense_adjacency(match_edges, NUM_MATCH_NODES)
    ref_adj_np = build_dense_adjacency(ref_edges, NUM_REF_NODES)

    # node embeddings: truncated normal, std = 1/sqrt(total nodes)  ('total' init)
    total_nodes = NUM_MATCH_NODES + NUM_REF_NODES
    std = 1.0 / math.sqrt(total_nodes)
    match_node_emb = truncated_normal(k_emb1, (NUM_MATCH_NODES, EMBEDDING_DIM), std)
    ref_node_emb = truncated_normal(k_emb2, (NUM_REF_NODES, EMBEDDING_DIM), std)

    # per-layer conv weights (shared between match/ref graphs, as in the module:
    # self.ref_weights = self.match_weights); biases initialized to zeros, shape (L, D).
    weights_f32 = jnp.stack([
        xavier_uniform(k_w0, (EMBEDDING_DIM, EMBEDDING_DIM)),
        xavier_uniform(k_w1, (EMBEDDING_DIM, EMBEDDING_DIM)),
    ], axis=0)                                                # (L, D, D) f32 (reference copy)
    biases = jnp.zeros((N_LAYERS, EMBEDDING_DIM), jnp.float32)  # (L, D)

    # Kernel inputs cast ONCE on the host to bf16 (halves adjacency/embedding/weight DMA and
    # removes in-kernel cast passes); biases stay f32 and are added into the f32 accumulator.
    adj_stacked = jnp.asarray(np.stack([
        pad2d(match_adj_np, NP, NP),
        pad2d(ref_adj_np, NP, NP),
    ], axis=0)).astype(jnp.bfloat16)                          # (2, NP, NP) bf16
    emb_stacked = jnp.asarray(np.stack([
        pad2d(np.asarray(match_node_emb), NP, EMBEDDING_DIM),
        pad2d(np.asarray(ref_node_emb), NP, EMBEDDING_DIM),
    ], axis=0)).astype(jnp.bfloat16)                          # (2, NP, D) bf16
    weights_bf16 = weights_f32.astype(jnp.bfloat16)           # (L, D, D) bf16

    tc_sharded = _use_tc_sharded_path()
    fwd = jax.jit(functools.partial(
        gcn_align_forward, n_layers=N_LAYERS, tc_sharded=tc_sharded))
    out = fwd(adj_stacked, emb_stacked, weights_bf16, biases)  # (2, NP, D) bf16
    jax.block_until_ready(out)

    match_out = out[0, :NUM_MATCH_NODES]
    ref_out = out[1, :NUM_REF_NODES]

    assert match_out.shape == (NUM_MATCH_NODES, EMBEDDING_DIM)
    assert ref_out.shape == (NUM_REF_NODES, EMBEDDING_DIM)
    assert bool(jnp.all(jnp.isfinite(match_out))) and bool(jnp.all(jnp.isfinite(ref_out)))

    # Numeric sanity check against a pure-JAX f32 reference (bf16 inputs/operands -> loose tol).
    match_ref_out = gcn_align_reference(
        jnp.asarray(match_adj_np), match_node_emb, weights_f32, biases, N_LAYERS)
    ref_ref_out = gcn_align_reference(
        jnp.asarray(ref_adj_np), ref_node_emb, weights_f32, biases, N_LAYERS)
    assert float(jnp.max(jnp.abs(match_out.astype(jnp.float32) - match_ref_out))) < 3e-2
    assert float(jnp.max(jnp.abs(ref_out.astype(jnp.float32) - ref_ref_out))) < 3e-2

    print("KERNEL_OK")
</pallas_src>

<mosaic_0001>
module attributes {stable_mosaic.version = 11 : i64} {
  func.func @gcn_align_batched_kernel(%arg0: i32, %arg1: memref<2x128x128xbf16, #tpu.memory_space<vmem>>, %arg2: memref<2x128x128xbf16, #tpu.memory_space<vmem>>, %arg3: memref<2x128x128xbf16, #tpu.memory_space<vmem>>, %arg4: memref<2x128xf32, #tpu.memory_space<vmem>>, %arg5: memref<2x128x128xbf16, #tpu.memory_space<vmem>>) attributes {dimension_semantics = [#tpu.dimension_semantics<arbitrary>], iteration_bounds = array<i64: 1>, scalar_prefetch = 0 : i64, scratch_operands = 0 : i64, tpu.core_type = #tpu.core_type<tc>, window_params = [{pipeline_mode = #tpu.pipeline_mode<synchronous>, transform_indices = @transform_0, window_bounds = array<i64: 2, 128, 128>}, {pipeline_mode = #tpu.pipeline_mode<synchronous>, transform_indices = @transform_1, window_bounds = array<i64: 2, 128, 128>}, {pipeline_mode = #tpu.pipeline_mode<synchronous>, transform_indices = @transform_2, window_bounds = array<i64: 2, 128, 128>}, {pipeline_mode = #tpu.pipeline_mode<synchronous>, transform_indices = @transform_3, window_bounds = array<i64: 2, 128>}, {pipeline_mode = #tpu.pipeline_mode<synchronous>, transform_indices = @transform_4, window_bounds = array<i64: 2, 128, 128>}]} {
    %c0 = arith.constant 0 : index
    %c0_0 = arith.constant 0 : index
    %c0_1 = arith.constant 0 : index
    %0 = vector.load %arg2[%c0, %c0_0, %c0_1] : memref<2x128x128xbf16, #tpu.memory_space<vmem>>, vector<2x128x128xbf16>
    %1 = arith.extf %0 : vector<2x128x128xbf16> to vector<2x128x128xf32>
    %2 = arith.mulf %1, %1 : vector<2x128x128xf32>
    %cst = arith.constant dense<0.000000e+00> : vector<2x128xf32>
    %3 = vector.multi_reduction <add>, %2, %cst [2] : vector<2x128x128xf32> to vector<2x128xf32>
    %4 = vector.shape_cast %3 : vector<2x128xf32> to vector<2x128x1xf32>
    %cst_2 = arith.constant 1.000000e-24 : f32
    %5 = vector.broadcast %cst_2 : f32 to vector<2x128x1xf32>
    %6 = arith.maximumf %4, %5 : vector<2x128x1xf32>
    %7 = math.rsqrt %6 : vector<2x128x1xf32>
    %8 = vector.broadcast %7 : vector<2x128x1xf32> to vector<2x128x128xf32>
    %9 = arith.mulf %1, %8 : vector<2x128x128xf32>
    %10 = arith.truncf %9 : vector<2x128x128xf32> to vector<2x128x128xbf16>
    %c0_3 = arith.constant 0 : index
    %c0_4 = arith.constant 0 : index
    %c0_5 = arith.constant 0 : index
    %11 = vector.load %arg1[%c0_3, %c0_4, %c0_5] : memref<2x128x128xbf16, #tpu.memory_space<vmem>>, vector<2x128x128xbf16>
    %c0_6 = arith.constant 0 : index
    %c0_7 = arith.constant 0 : index
    %12 = vector.load %arg4[%c0_6, %c0_7] : memref<2x128xf32, #tpu.memory_space<vmem>>, vector<2x128xf32>
    "tpu.trace_start"() <{level = 10 : i32, message = "gij,gjd->gid"}> : () -> ()
    %cst_8 = arith.constant dense<0.000000e+00> : vector<2x128x128xf32>
    %13 = tpu.matmul %11, %10, %cst_8 {dimension_numbers = #tpu.dot_dimension_numbers<[2], [1], [1], [2], [0, 0, 0, 1, 1, 2], [0], [0]>} : vector<2x128x128xbf16>, vector<2x128x128xbf16>, vector<2x128x128xf32> -> vector<2x128x128xf32>
    "tpu.trace_stop"() : () -> ()
    %14 = vector.shape_cast %13 : vector<2x128x128xf32> to vector<256x128xf32>
    %15 = arith.truncf %14 : vector<256x128xf32> to vector<256x128xbf16>
    %c0_9 = arith.constant 0 : index
    %c0_10 = arith.constant 0 : index
    %c0_11 = arith.constant 0 : index
    %16 = vector.load %arg3[%c0_9, %c0_10, %c0_11] : memref<2x128x128xbf16, #tpu.memory_space<vmem>>, vector<1x128x128xbf16>
    %17 = vector.shape_cast %16 : vector<1x128x128xbf16> to vector<128x128xbf16>
    %cst_12 = arith.constant dense<0.000000e+00> : vector<256x128xf32>
    %18 = tpu.matmul %15, %17, %cst_12 {dimension_numbers = #tpu.dot_dimension_numbers<[1], [0], [0], [1], [0, 0, 1, 1], [], []>} : vector<256x128xbf16>, vector<128x128xbf16>, vector<256x128xf32> -> vector<256x128xf32>
    %19 = vector.extract_strided_slice %12 {offsets = [0, 0], sizes = [1, 128], strides = [1, 1]} : vector<2x128xf32> to vector<1x128xf32>
    %20 = vector.broadcast %19 : vector<1x128xf32> to vector<256x128xf32>
    %21 = arith.addf %18, %20 : vector<256x128xf32>
    %cst_13 = arith.constant 0.000000e+00 : f32
    %22 = vector.broadcast %cst_13 : f32 to vector<256x128xf32>
    %23 = arith.maximumf %21, %22 : vector<256x128xf32>
    %24 = arith.truncf %23 : vector<256x128xf32> to vector<256x128xbf16>
    %25 = vector.shape_cast %24 : vector<256x128xbf16> to vector<2x128x128xbf16>
    "tpu.trace_start"() <{level = 10 : i32, message = "gij,gjd->gid"}> : () -> ()
    %cst_14 = arith.constant dense<0.000000e+00> : vector<2x128x128xf32>
    %26 = tpu.matmul %11, %25, %cst_14 {dimension_numbers = #tpu.dot_dimension_numbers<[2], [1], [1], [2], [0, 0, 0, 1, 1, 2], [0], [0]>} : vector<2x128x128xbf16>, vector<2x128x128xbf16>, vector<2x128x128xf32> -> vector<2x128x128xf32>
    "tpu.trace_stop"() : () -> ()
    %27 = vector.shape_cast %26 : vector<2x128x128xf32> to vector<256x128xf32>
    %28 = arith.truncf %27 : vector<256x128xf32> to vector<256x128xbf16>
    %c1 = arith.constant 1 : index
    %c0_15 = arith.constant 0 : index
    %c0_16 = arith.constant 0 : index
    %29 = vector.load %arg3[%c1, %c0_15, %c0_16] : memref<2x128x128xbf16, #tpu.memory_space<vmem>>, vector<1x128x128xbf16>
    %30 = vector.shape_cast %29 : vector<1x128x128xbf16> to vector<128x128xbf16>
    %cst_17 = arith.constant dense<0.000000e+00> : vector<256x128xf32>
    %31 = tpu.matmul %28, %30, %cst_17 {dimension_numbers = #tpu.dot_dimension_numbers<[1], [0], [0], [1], [0, 0, 1, 1], [], []>} : vector<256x128xbf16>, vector<128x128xbf16>, vector<256x128xf32> -> vector<256x128xf32>
    %32 = vector.extract_strided_slice %12 {offsets = [1, 0], sizes = [1, 128], strides = [1, 1]} : vector<2x128xf32> to vector<1x128xf32>
    %33 = vector.broadcast %32 : vector<1x128xf32> to vector<256x128xf32>
    %34 = arith.addf %31, %33 : vector<256x128xf32>
    %cst_18 = arith.constant 0.000000e+00 : f32
    %35 = vector.broadcast %cst_18 : f32 to vector<256x128xf32>
    %36 = arith.maximumf %34, %35 : vector<256x128xf32>
    %37 = arith.truncf %36 : vector<256x128xf32> to vector<256x128xbf16>
    %38 = vector.shape_cast %37 : vector<256x128xbf16> to vector<2x128x128xbf16>
    %c0_19 = arith.constant 0 : index
    %c0_20 = arith.constant 0 : index
    %c0_21 = arith.constant 0 : index
    %39 = vector.load %arg5[%c0_19, %c0_20, %c0_21] : memref<2x128x128xbf16, #tpu.memory_space<vmem>>, vector<2x128x128xbf16>
    tpu.vector_store %arg5[%c0_19, %c0_20, %c0_21], %38 {strides = array<i32>} : memref<2x128x128xbf16, #tpu.memory_space<vmem>>, vector<2x128x128xbf16>,
    return
  }
  func.func @transform_0(%arg0: i32) -> (i32, i32, i32) {
    %c0_i32 = arith.constant 0 : i32
    %c0_i32_0 = arith.constant 0 : i32
    %c0_i32_1 = arith.constant 0 : i32
    %c0_i32_2 = arith.constant 0 : i32
    return %c0_i32, %c0_i32_0, %c0_i32_1 : i32, i32, i32
  }
  func.func @transform_1(%arg0: i32) -> (i32, i32, i32) {
    %c0_i32 = arith.constant 0 : i32
    %c0_i32_0 = arith.constant 0 : i32
    %c0_i32_1 = arith.constant 0 : i32
    %c0_i32_2 = arith.constant 0 : i32
    return %c0_i32, %c0_i32_0, %c0_i32_1 : i32, i32, i32
  }
  func.func @transform_2(%arg0: i32) -> (i32, i32, i32) {
    %c0_i32 = arith.constant 0 : i32
    %c0_i32_0 = arith.constant 0 : i32
    %c0_i32_1 = arith.constant 0 : i32
    %c0_i32_2 = arith.constant 0 : i32
    return %c0_i32, %c0_i32_0, %c0_i32_1 : i32, i32, i32
  }
  func.func @transform_3(%arg0: i32) -> (i32, i32) {
    %c0_i32 = arith.constant 0 : i32
    %c0_i32_0 = arith.constant 0 : i32
    %c0_i32_1 = arith.constant 0 : i32
    return %c0_i32, %c0_i32_0 : i32, i32
  }
  func.func @transform_4(%arg0: i32) -> (i32, i32, i32) {
    %c0_i32 = arith.constant 0 : i32
    %c0_i32_0 = arith.constant 0 : i32
    %c0_i32_1 = arith.constant 0 : i32
    %c0_i32_2 = arith.constant 0 : i32
    return %c0_i32, %c0_i32_0, %c0_i32_1 : i32, i32, i32
  }
}

</mosaic_0001>

<bundles_post_ra>
// kernel: gcn_align_forward.1
= control target key start
LH: loop header
LB: loop body
LE: loop exit
PB: predicated region body
PF: predicated region fallthrough
CT: control target
= control target key end

     0   :  { %9 = vsyncpa [#allocation3], 0  ;;  %s2801_s0 = inlined_call_operand.hbm [shape: bf16[2,128,128], index: 0, kind: input, shape index: {}]   ;;  %s2802_s1 = inlined_call_operand.hbm [shape: bf16[2,128,128], index: 1, kind: input, shape index: {}]   ;;  %s2803_s2 = inlined_call_operand.hbm [shape: bf16[2,128,128], index: 2, kind: input, shape index: {}]   ;;  %s2804_s3 = inlined_call_operand.vmem [shape: f32[2,128], index: 3, kind: input, shape index: {}]   ;;  %s2805_s4 = inlined_call_operand.hbm [shape: bf16[2,128,128], index: 4, kind: output, shape index: {}]  }
   0x1   :  { %10 = vsyncpa [#allocation6], 0 }
   0x2   :  { %11 = vsyncpa [#allocation4], 0  ;;  %s2400_s15 = smov [#allocation5]   ;;  %s2401_s17 = smov [#allocation2]  }
   0x3   :  { %s29_s16 = sshll.u32 %s2400_s15, 4  ;;  %s17_s18 = sshll.u32 %s2401_s17, 4  ;;  %s30_s16 = int_to_ptr.vmem [resolvable:$true] %s29_s16  ;;  %s2431_s18 = int_to_ptr.vmem [resolvable:$true] %s17_s18 }
   0x4   :  { %s2306_s21 = scalar_lea.hbm %s2802_s1, 2048 }
   0x5   :  { %p2307_p0 = scmp.ne.s32.totalorder %s2802_s1, %s2306_s21  ;;  %p2310_p1 = scmp.lt.u32.totalorder %s2306_s21, %s2802_s1 }
   0x7   :  { %p2312_p2 = pnand %p2310_p1, %p2307_p0 }
   0x9   :  { %2315 = shalt.err (!%p2312_p2)
}
   0xa   :  { %s2316_s26 = scalar_lea.vmem %s30_s16, 2048  ;;  %p2321_p4 = scmp.lt.s32.totalorder %s30_s16, %s30_s16 }
   0xb   :  { %p2317_p3 = scmp.ne.s32.totalorder %s30_s16, %s2316_s26  ;;  %p2322_p5 = scmp.lt.s32.totalorder %s2316_s26, %s2316_s26 }
   0xd   :  { %p2323_p6 = por %p2322_p5, %p2321_p4 }
   0xf   :  { %p2324_p7 = pnand %p2323_p6, %p2317_p3 }
  0x11   :  { %2327 = shalt.err (!%p2324_p7)
}
  0x12   :  { %s2402_s27 = smov 64   ;;  %s2403_s28 = smov 4  }
  0x13   :  { %35 = dma.hbm_to_vmem [thread:$0]  %s2802_s1, 2048, %s30_s16, [#allocation6], %s2402_s27, %s2402_s27, %s2403_s28  }
  0x14   :  { %s2328_s7 = scalar_lea.hbm %s2801_s0, 2048 }
  0x15   :  { %p2329_p8 = scmp.ne.s32.totalorder %s2801_s0, %s2328_s7  ;;  %p2332_p9 = scmp.lt.u32.totalorder %s2328_s7, %s2801_s0 }
  0x17   :  { %p2334_p10 = pnand %p2332_p9, %p2329_p8 }
  0x19   :  { %2337 = shalt.err (!%p2334_p10)
}
  0x1a   :  { %s2338_s12 = scalar_lea.vmem %s2431_s18, 2048  ;;  %p2343_p12 = scmp.lt.s32.totalorder %s2431_s18, %s2431_s18 }
  0x1b   :  { %p2339_p11 = scmp.ne.s32.totalorder %s2431_s18, %s2338_s12  ;;  %p2344_p13 = scmp.lt.s32.totalorder %s2338_s12, %s2338_s12 }
  0x1d   :  { %p2345_p0 = por %p2344_p13, %p2343_p12 }
  0x1f   :  { %p2346_p1 = pnand %p2345_p0, %p2339_p11 }
  0x21   :  { %2349 = shalt.err (!%p2346_p1)
}
  0x22   :  { %23 = dma.hbm_to_vmem [thread:$0]  %s2801_s0, 2048, %s2431_s18, [#allocation3], %s2402_s27, %s2402_s27, %s2403_s28  }
  0x23   :  { %s2404_s14 = smov [#allocation7]   ;;  %s2350_s19 = scalar_lea.hbm %s2803_s2, 2048 }
  0x24   :  { %s41_s15 = sshll.u32 %s2404_s14, 4  ;;  %p2351_p2 = scmp.ne.s32.totalorder %s2803_s2, %s2350_s19  ;;  %s42_s15 = int_to_ptr.vmem [resolvable:$true] %s41_s15 }
  0x25   :  { %p2354_p3 = scmp.lt.u32.totalorder %s2350_s19, %s2803_s2 }
  0x27   :  { %p2356_p4 = pnand %p2354_p3, %p2351_p2 }
  0x29   :  { %2359 = shalt.err (!%p2356_p4)
}
  0x2a   :  { %s2360_s24 = scalar_lea.vmem %s42_s15, 2048  ;;  %p2365_p6 = scmp.lt.s32.totalorder %s42_s15, %s42_s15 }
  0x2b   :  { %p2361_p5 = scmp.ne.s32.totalorder %s42_s15, %s2360_s24  ;;  %p2366_p7 = scmp.lt.s32.totalorder %s2360_s24, %s2360_s24 }
  0x2d   :  { %p2367_p8 = por %p2366_p7, %p2365_p6 }
  0x2f   :  { %p2368_p9 = pnand %p2367_p8, %p2361_p5 }
  0x31   :  { %2371 = shalt.err (!%p2368_p9)
}
  0x32   :  { %47 = dma.hbm_to_vmem [thread:$0]  %s2803_s2, 2048, %s42_s15, [#allocation6], %s2402_s27, %s2402_s27, %s2403_s28  }
  0x33   :  { %2394 = dma.done.wait [#allocation3], 2048  }
  0x34   :  { %2395 = vsyncadd [#allocation3], 4294965248 }
  0x35   :  { %2396 = dma.done.wait [#allocation6], 4096  }
  0x36   :  { %2397 = vsyncadd [#allocation6], 4294963200  ;;  %v1838_v0 = vld [vmem:[#allocation5 + $0x8] sm:$0xff]   ;;  %v1695_v1 = vld [vmem:[#allocation5] sm:$0xff]  }
  0x37   :  { %v2483_v2 = vunpack.c.l.bf16 %v1838_v0  ;;  %v2485_v3 = vunpack.c.l.bf16 %v1695_v1  ;;  %v2487_v4 = vunpack.c.h.bf16 %v1838_v0  ;;  %v2489_v5 = vunpack.c.h.bf16 %v1695_v1  ;;  %v1839_v6 = vld [vmem:[#allocation5 + $0x10] sm:$0xff]   ;;  %v1840_v13 = vld [vmem:[#allocation5 + $0x18] sm:$0xff]   ;;  %v1841_v14 = vld [vmem:[#allocation5 + $0x20] sm:$0xff]  }
  0x38   :  { %v2499_v11 = vunpack.c.h.bf16 %v1839_v6  ;;  %v2501_v12 = vunpack.c.l.bf16 %v1839_v6  ;;  %v2507_v17 = vunpack.c.h.bf16 %v1840_v13  ;;  %v2509_v18 = vunpack.c.l.bf16 %v1840_v13  ;;  %v1842_v19 = vld [vmem:[#allocation5 + $0x28] sm:$0xff]   ;;  %v1843_v24 = vld [vmem:[#allocation5 + $0x30] sm:$0xff]   ;;  %v1844_v29 = vld [vmem:[#allocation5 + $0x38] sm:$0xff]  }
  0x39   :  { %v126_v7 = vmul.f32 %v2483_v2, %v2483_v2  ;;  %v124_v8 = vmul.f32 %v2485_v3, %v2485_v3  ;;  %v127_v9 = vmul.f32 %v2487_v4, %v2487_v4  ;;  %v125_v10 = vmul.f32 %v2489_v5, %v2489_v5  ;;  %v1845_v38 = vld [vmem:[#allocation5 + $0x40] sm:$0xff]   ;;  %v1846_v43 = vld [vmem:[#allocation5 + $0x48] sm:$0xff]   ;;  %v1847_v48 = vld [vmem:[#allocation5 + $0x50] sm:$0xff]  }
  0x3a   :  { %v129_v15 = vmul.f32 %v2499_v11, %v2499_v11  ;;  %v128_v16 = vmul.f32 %v2501_v12, %v2501_v12  ;;  %v131_v20 = vmul.f32 %v2507_v17, %v2507_v17  ;;  %v130_v21 = vmul.f32 %v2509_v18, %v2509_v18  ;;  %v1848_v53 = vld [vmem:[#allocation5 + $0x58] sm:$0xff]   ;;  %v1849_v58 = vld [vmem:[#allocation5 + $0x60] sm:$0xff]   ;;  %v1850_v63 = vld [vmem:[#allocation5 + $0x68] sm:$0xff]  }
  0x3b   :  { %160 = vadd.xlane.f32.xlu1 %v126_v7  ;;  %156 = vadd.xlane.f32.xlu0 %v124_v8  ;;  %v2515_v22 = vunpack.c.h.bf16 %v1841_v14  ;;  %v2517_v23 = vunpack.c.l.bf16 %v1841_v14  ;;  %v2523_v27 = vunpack.c.h.bf16 %v1842_v19  ;;  %v2525_v28 = vunpack.c.l.bf16 %v1842_v19  ;;  %v1851_v8 = vld [vmem:[#allocation5 + $0x70] sm:$0xff]  }
  0x3c   :  { %v2531_v32 = vunpack.c.h.bf16 %v1843_v24  ;;  %v2533_v33 = vunpack.c.l.bf16 %v1843_v24  ;;  %v2539_v36 = vunpack.c.h.bf16 %v1844_v29  ;;  %v2541_v37 = vunpack.c.l.bf16 %v1844_v29  ;;  %v2226_v29 = vld [vmem:[#allocation7] sm:$0xff]  }
  0x3d   :  { %v133_v25 = vmul.f32 %v2515_v22, %v2515_v22  ;;  %v132_v26 = vmul.f32 %v2517_v23, %v2517_v23  ;;  %v135_v30 = vmul.f32 %v2523_v27, %v2523_v27  ;;  %v134_v31 = vmul.f32 %v2525_v28, %v2525_v28  ;;  %2044 = vmatprep.subr.bf16.mxu0 %v2226_v29 }
  0x3e   :  { %v137_v34 = vmul.f32 %v2531_v32, %v2531_v32  ;;  %v136_v35 = vmul.f32 %v2533_v33, %v2533_v33  ;;  %v139_v39 = vmul.f32 %v2539_v36, %v2539_v36  ;;  %v138_v40 = vmul.f32 %v2541_v37, %v2541_v37  ;;  %2045 = vmatpush3.bf16.msra.mxu0 %v2226_v29 }
  0x3f   :  { %162 = vadd.xlane.f32.xlu1 %v127_v9  ;;  %158 = vadd.xlane.f32.xlu0 %v125_v10  ;;  %v2547_v41 = vunpack.c.h.bf16 %v1845_v38  ;;  %v2549_v42 = vunpack.c.l.bf16 %v1845_v38  ;;  %v2555_v46 = vunpack.c.h.bf16 %v1846_v43  ;;  %v2557_v47 = vunpack.c.l.bf16 %v1846_v43  ;;  %v2231_v38 = vld [vmem:[#allocation7 + $0x28] sm:$0xff]  }
  0x40   :  { %v2563_v51 = vunpack.c.h.bf16 %v1847_v48  ;;  %v2565_v52 = vunpack.c.l.bf16 %v1847_v48  ;;  %v2571_v56 = vunpack.c.h.bf16 %v1848_v53  ;;  %v2573_v57 = vunpack.c.l.bf16 %v1848_v53 }
  0x41   :  { %v141_v44 = vmul.f32 %v2547_v41, %v2547_v41  ;;  %v140_v45 = vmul.f32 %v2549_v42, %v2549_v42  ;;  %v143_v49 = vmul.f32 %v2555_v46, %v2555_v46  ;;  %v142_v50 = vmul.f32 %v2557_v47, %v2557_v47 }
  0x42   :  { %v145_v54 = vmul.f32 %v2563_v51, %v2563_v51  ;;  %v144_v55 = vmul.f32 %v2565_v52, %v2565_v52  ;;  %v147_v59 = vmul.f32 %v2571_v56, %v2571_v56  ;;  %v146_v60 = vmul.f32 %v2573_v57, %v2573_v57 }
  0x43   :  { %166 = vadd.xlane.f32.xlu1 %v129_v15  ;;  %164 = vadd.xlane.f32.xlu0 %v128_v16  ;;  %v2579_v61 = vunpack.c.h.bf16 %v1849_v58  ;;  %v2581_v62 = vunpack.c.l.bf16 %v1849_v58  ;;  %v2587_v6 = vunpack.c.h.bf16 %v1850_v63  ;;  %v2589_v7 = vunpack.c.l.bf16 %v1850_v63  ;;  %v1852_v15 = vld [vmem:[#allocation5 + $0x78] sm:$0xff]  }
  0x44   :  { %v2595_v13 = vunpack.c.h.bf16 %v1851_v8  ;;  %v2597_v14 = vunpack.c.l.bf16 %v1851_v8 }
  0x45   :  { %v149_v0 = vmul.f32 %v2579_v61, %v2579_v61  ;;  %v148_v1 = vmul.f32 %v2581_v62, %v2581_v62  ;;  %v151_v9 = vmul.f32 %v2587_v6, %v2587_v6  ;;  %v150_v10 = vmul.f32 %v2589_v7, %v2589_v7 }
  0x46   :  { %v153_v16 = vmul.f32 %v2595_v13, %v2595_v13  ;;  %v152_v19 = vmul.f32 %v2597_v14, %v2597_v14 }
  0x47   :  { %170 = vadd.xlane.f32.xlu1 %v131_v20  ;;  %168 = vadd.xlane.f32.xlu0 %v130_v21  ;;  %v2603_v20 = vunpack.c.h.bf16 %v1852_v15  ;;  %v2605_v21 = vunpack.c.l.bf16 %v1852_v15 }
  0x49   :  { %v155_v24 = vmul.f32 %v2603_v20, %v2603_v20 }
  0x4b   :  { %174 = vadd.xlane.f32.xlu1 %v133_v25  ;;  %172 = vadd.xlane.f32.xlu0 %v132_v26  ;;  %v154_v25 = vmul.f32 %v2605_v21, %v2605_v21  ;;  %v2611_v26 = vld [vmem:[#allocation2] sm:$0xff]  }
  0x4c   :  { %1996 = vmatprep.mubr.bf16.mxu1 %v2611_v26 }
  0x4f   :  { %178 = vadd.xlane.f32.xlu1 %v135_v30  ;;  %176 = vadd.xlane.f32.xlu0 %v134_v31  ;;  %v2227_v30 = vld [vmem:[#allocation7 + $0x8] sm:$0xff]   ;;  %v2228_v31 = vld [vmem:[#allocation7 + $0x10] sm:$0xff]  }
  0x50   :  { %2046 = vmatprep.subr.bf16.mxu0 %v2227_v30 }
  0x51   :  { %2047 = vmatpush3.bf16.msra.mxu0 %v2227_v30 }
  0x52   :  { %2048 = vmatprep.subr.bf16.mxu0 %v2228_v31 }
  0x53   :  { %182 = vadd.xlane.f32.xlu1 %v137_v34  ;;  %180 = vadd.xlane.f32.xlu0 %v136_v35  ;;  %v2229_v34 = vld [vmem:[#allocation7 + $0x18] sm:$0xff]   ;;  %v2230_v35 = vld [vmem:[#allocation7 + $0x20] sm:$0xff]  }
  0x55   :  { %2049 = vmatpush3.bf16.msra.mxu0 %v2228_v31 }
  0x56   :  { %2050 = vmatprep.subr.bf16.mxu0 %v2229_v34 }
  0x57   :  { %186 = vadd.xlane.f32.xlu1 %v139_v39  ;;  %184 = vadd.xlane.f32.xlu0 %v138_v40 }
  0x59   :  { %2051 = vmatpush3.bf16.msra.mxu0 %v2229_v34 }
  0x5a   :  { %2052 = vmatprep.subr.bf16.mxu0 %v2230_v35 }
  0x5b   :  { %190 = vadd.xlane.f32.xlu1 %v141_v44  ;;  %188 = vadd.xlane.f32.xlu0 %v140_v45  ;;  %v2232_v45 = vld [vmem:[#allocation7 + $0x30] sm:$0xff]  }
  0x5d   :  { %2053 = vmatpush3.bf16.msra.mxu0 %v2230_v35 }
  0x5e   :  { %2054 = vmatprep.subr.bf16.mxu0 %v2231_v38 }
  0x5f   :  { %194 = vadd.xlane.f32.xlu1 %v143_v49  ;;  %192 = vadd.xlane.f32.xlu0 %v142_v50 }
  0x61   :  { %2055 = vmatpush3.bf16.msra.mxu0 %v2231_v38 }
  0x62   :  { %2056 = vmatprep.subr.bf16.mxu0 %v2232_v45 }
  0x63   :  { %198 = vadd.xlane.f32.xlu1 %v145_v54  ;;  %196 = vadd.xlane.f32.xlu0 %v144_v55 }
  0x65   :  { %2057 = vmatpush3.bf16.msra.mxu0 %v2232_v45 }
  0x67   :  { %202 = vadd.xlane.f32.xlu1 %v147_v59  ;;  %200 = vadd.xlane.f32.xlu0 %v146_v60 }
  0x6b   :  { %206 = vadd.xlane.f32.xlu1 %v149_v0  ;;  %204 = vadd.xlane.f32.xlu0 %v148_v1 }
  0x6f   :  { %210 = vadd.xlane.f32.xlu1 %v151_v9  ;;  %208 = vadd.xlane.f32.xlu0 %v150_v10 }
  0x73   :  { %214 = vadd.xlane.f32.xlu1 %v153_v16  ;;  %212 = vadd.xlane.f32.xlu0 %v152_v19 }
  0x77   :  { %218 = vadd.xlane.f32.xlu1 %v155_v24  ;;  %216 = vadd.xlane.f32.xlu0 %v154_v25 }
  0xc8   :  { %v161_v39 = vpop.xlane.xlu1 %160  ;;  %v157_v40 = vpop.xlane.xlu0 %156 }
  0xc9   :  { %v222_v43 = vmax.f32 %v161_v39, 1e-24  ;;  %v220_v44 = vmax.f32 %v157_v40, 1e-24 }
  0xcb   :  { %2242 = vrsqrt.f32 %v222_v43 }
  0xcc   :  { %v163_v48 = vpop.xlane.xlu1 %162  ;;  %v159_v49 = vpop.xlane.xlu0 %158  ;;  %2244 = vrsqrt.f32 %v220_v44 }
  0xcd   :  { %v223_v50 = vmax.f32 %v163_v48, 1e-24  ;;  %v221_v53 = vmax.f32 %v159_v49, 1e-24 }
  0xcf   :  { %2246 = vrsqrt.f32 %v223_v50 }
  0xd0   :  { %2248 = vrsqrt.f32 %v221_v53  ;;  %v167_v54 = vpop.xlane.xlu1 %166  ;;  %v165_v55 = vpop.xlane.xlu0 %164 }
  0xd1   :  { %v225_v58 = vmax.f32 %v167_v54, 1e-24  ;;  %v224_v59 = vmax.f32 %v165_v55, 1e-24 }
  0xd3   :  { %2250 = vrsqrt.f32 %v225_v58 }
  0xd4   :  { %2252 = vrsqrt.f32 %v224_v59  ;;  %v171_v60 = vpop.xlane.xlu1 %170  ;;  %v169_v63 = vpop.xlane.xlu0 %168 }
  0xd5   :  { %v227_v0 = vmax.f32 %v171_v60, 1e-24  ;;  %v226_v1 = vmax.f32 %v169_v63, 1e-24  ;;  %v2243_v8 = vpop.eup %2242 }
  0xd6   :  { %v2245_v9 = vpop.eup %2244  ;;  %v286_v29 = vmul.f32 %v2243_v8, %v2483_v2 }
  0xd7   :  { %2254 = vrsqrt.f32 %v227_v0  ;;  %v284_v30 = vmul.f32 %v2245_v9, %v2485_v3 }
  0xd8   :  { %2256 = vrsqrt.f32 %v226_v1  ;;  %v175_v10 = vpop.xlane.xlu1 %174  ;;  %v173_v15 = vpop.xlane.xlu0 %172 }
  0xd9   :  { %v2247_v16 = vpop.eup %2246  ;;  %v229_v19 = vmax.f32 %v175_v10, 1e-24  ;;  %v228_v24 = vmax.f32 %v173_v15, 1e-24 }
  0xda   :  { %v2249_v25 = vpop.eup %2248  ;;  %v287_v34 = vmul.f32 %v2247_v16, %v2487_v4 }
  0xdb   :  { %2258 = vrsqrt.f32 %v229_v19  ;;  %v285_v31 = vmul.f32 %v2249_v25, %v2489_v5 }
  0xdc   :  { %2260 = vrsqrt.f32 %v228_v24  ;;  %v179_v35 = vpop.xlane.xlu1 %178  ;;  %v177_v38 = vpop.xlane.xlu0 %176  ;;  %v317_v2 = vpack.c.bf16 %v287_v34, %v286_v29 }
  0xdd   :  { %v2251_v39 = vpop.eup %2250  ;;  %v316_v40 = vpack.c.bf16 %v285_v31, %v284_v30  ;;  %v231_v43 = vmax.f32 %v179_v35, 1e-24  ;;  %v230_v44 = vmax.f32 %v177_v38, 1e-24 }
  0xde   :  { %v2253_v45 = vpop.eup %2252  ;;  %v289_v48 = vmul.f32 %v2251_v39, %v2499_v11 }
  0xdf   :  { %1980 = vmatprep.subr.bf16.mxu1 %v316_v40  ;;  %2262 = vrsqrt.f32 %v231_v43  ;;  %v288_v49 = vmul.f32 %v2253_v45, %v2501_v12 }
  0xe0   :  { %1981 = vmatpush3.bf16.msra.mxu1 %v316_v40  ;;  %2264 = vrsqrt.f32 %v230_v44  ;;  %v183_v3 = vpop.xlane.xlu1 %182  ;;  %v181_v5 = vpop.xlane.xlu0 %180 }
  0xe1   :  { %v2255_v4 = vpop.eup %2254  ;;  %1982 = vmatprep.subr.bf16.mxu1 %v317_v2  ;;  %v233_v50 = vmax.f32 %v183_v3, 1e-24  ;;  %v232_v53 = vmax.f32 %v181_v5, 1e-24  ;;  %v318_v54 = vpack.c.bf16 %v289_v48, %v288_v49 }
  0xe2   :  { %v2257_v55 = vpop.eup %2256  ;;  %v291_v58 = vmul.f32 %v2255_v4, %v2507_v17 }
  0xe3   :  { %2266 = vrsqrt.f32 %v233_v50  ;;  %v290_v11 = vmul.f32 %v2257_v55, %v2509_v18 }
  0xe4   :  { %1983 = vmatpush3.bf16.msra.mxu1 %v317_v2  ;;  %2268 = vrsqrt.f32 %v232_v53  ;;  %v187_v59 = vpop.xlane.xlu1 %186  ;;  %v185_v60 = vpop.xlane.xlu0 %184 }
  0xe5   :  { %v2259_v12 = vpop.eup %2258  ;;  %1984 = vmatprep.subr.bf16.mxu1 %v318_v54  ;;  %v235_v63 = vmax.f32 %v187_v59, 1e-24  ;;  %v234_v0 = vmax.f32 %v185_v60, 1e-24  ;;  %v319_v1 = vpack.c.bf16 %v291_v58, %v290_v11 }
  0xe6   :  { %v2261_v8 = vpop.eup %2260  ;;  %v293_v9 = vmul.f32 %v2259_v12, %v2515_v22 }
  0xe7   :  { %2270 = vrsqrt.f32 %v235_v63  ;;  %v292_v10 = vmul.f32 %v2261_v8, %v2517_v23  ;;  %v2633_v8 = vld [vmem:[#allocation2 + $0x8] sm:$0xff]  }
  0xe8   :  { %1985 = vmatpush3.bf16.msra.mxu1 %v318_v54  ;;  %2272 = vrsqrt.f32 %v234_v0  ;;  %v191_v17 = vpop.xlane.xlu1 %190  ;;  %v189_v15 = vpop.xlane.xlu0 %188 }
  0xe9   :  { %v2263_v18 = vpop.eup %2262  ;;  %1986 = vmatprep.subr.bf16.mxu1 %v319_v1  ;;  %v237_v16 = vmax.f32 %v191_v17, 1e-24  ;;  %v236_v19 = vmax.f32 %v189_v15, 1e-24  ;;  %v320_v24 = vpack.c.bf16 %v293_v9, %v292_v10  ;;  %v2636_v10 = vld [vmem:[#allocation2 + $0x10] sm:$0xff]  }
  0xea   :  { %v2265_v25 = vpop.eup %2264  ;;  %v295_v29 = vmul.f32 %v2263_v18, %v2523_v27 }
  0xeb   :  { %2274 = vrsqrt.f32 %v237_v16  ;;  %v294_v30 = vmul.f32 %v2265_v25, %v2525_v28 }
  0xec   :  { %1987 = vmatpush3.bf16.msra.mxu1 %v319_v1  ;;  %2276 = vrsqrt.f32 %v236_v19  ;;  %v195_v22 = vpop.xlane.xlu1 %194  ;;  %v193_v31 = vpop.xlane.xlu0 %192 }
  0xed   :  { %v2267_v23 = vpop.eup %2266  ;;  %1988 = vmatprep.subr.bf16.mxu1 %v320_v24  ;;  %v239_v34 = vmax.f32 %v195_v22, 1e-24  ;;  %v238_v35 = vmax.f32 %v193_v31, 1e-24  ;;  %v321_v38 = vpack.c.bf16 %v295_v29, %v294_v30 }
  0xee   :  { %v2269_v39 = vpop.eup %2268  ;;  %v297_v40 = vmul.f32 %v2267_v23, %v2531_v32 }
  0xef   :  { %2278 = vrsqrt.f32 %v239_v34  ;;  %v296_v43 = vmul.f32 %v2269_v39, %v2533_v33  ;;  %v2646_v39 = vld [vmem:[#allocation2 + $0x20] sm:$0xff]  }
  0xf0   :  { %1989 = vmatpush3.bf16.msra.mxu1 %v320_v24  ;;  %2280 = vrsqrt.f32 %v238_v35  ;;  %v199_v27 = vpop.xlane.xlu1 %198  ;;  %v197_v44 = vpop.xlane.xlu0 %196 }
  0xf1   :  { %v2271_v28 = vpop.eup %2270  ;;  %1990 = vmatprep.subr.bf16.mxu1 %v321_v38  ;;  %v241_v45 = vmax.f32 %v199_v27, 1e-24  ;;  %v240_v48 = vmax.f32 %v197_v44, 1e-24  ;;  %v322_v2 = vpack.c.bf16 %v297_v40, %v296_v43 }
  0xf2   :  { %v2273_v49 = vpop.eup %2272  ;;  %v299_v3 = vmul.f32 %v2271_v28, %v2539_v36 }
  0xf3   :  { %2282 = vrsqrt.f32 %v241_v45  ;;  %v298_v5 = vmul.f32 %v2273_v49, %v2541_v37 }
  0xf4   :  { %1991 = vmatpush3.bf16.msra.mxu1 %v321_v38  ;;  %2284 = vrsqrt.f32 %v240_v48  ;;  %v203_v32 = vpop.xlane.xlu1 %202  ;;  %v201_v4 = vpop.xlane.xlu0 %200 }
  0xf5   :  { %v2275_v33 = vpop.eup %2274  ;;  %1992 = vmatprep.subr.bf16.mxu1 %v322_v2  ;;  %v243_v50 = vmax.f32 %v203_v32, 1e-24  ;;  %v242_v53 = vmax.f32 %v201_v4, 1e-24  ;;  %v323_v54 = vpack.c.bf16 %v299_v3, %v298_v5  ;;  %v2653_v3 = vld [vmem:[#allocation2 + $0x28] sm:$0xff]  }
  0xf6   :  { %v2277_v55 = vpop.eup %2276  ;;  %v301_v58 = vmul.f32 %v2275_v33, %v2547_v41 }
  0xf7   :  { %2286 = vrsqrt.f32 %v243_v50  ;;  %v300_v11 = vmul.f32 %v2277_v55, %v2549_v42  ;;  %v2663_v55 = vld [vmem:[#allocation2 + $0x38] sm:$0xff]  }
  0xf8   :  { %1993 = vmatpush3.bf16.msra.mxu1 %v322_v2  ;;  %2288 = vrsqrt.f32 %v242_v53  ;;  %v207_v36 = vpop.xlane.xlu1 %206  ;;  %v205_v59 = vpop.xlane.xlu0 %204 }
  0xf9   :  { %v2279_v37 = vpop.eup %2278  ;;  %1994 = vmatprep.subr.bf16.mxu1 %v323_v54  ;;  %v245_v60 = vmax.f32 %v207_v36, 1e-24  ;;  %v244_v12 = vmax.f32 %v205_v59, 1e-24  ;;  %v324_v63 = vpack.c.bf16 %v301_v58, %v300_v11  ;;  %v2666_v11 = vld [vmem:[#allocation2 + $0x40] sm:$0xff]   ;;  %v2672_v36 = vld [vmem:[#allocation2 + $0x50] sm:$0xff]  }
  0xfa   :  { %v2281_v0 = vpop.eup %2280  ;;  %v303_v1 = vmul.f32 %v2279_v37, %v2555_v46  ;;  %v2682_v59 = vld [vmem:[#allocation2 + $0x68] sm:$0xff]   ;;  %v2684_v37 = vld [vmem:[#allocation2 + $0x70] sm:$0xff]  }
  0xfb   :  { %2290 = vrsqrt.f32 %v245_v60  ;;  %v302_v41 = vmul.f32 %v2281_v0, %v2557_v47  ;;  %v2688_v60 = vld [vmem:[#allocation2 + $0x78] sm:$0xff]  }
  0xfc   :  { %1995 = vmatpush3.bf16.msra.mxu1 %v323_v54  ;;  %2292 = vrsqrt.f32 %v244_v12  ;;  %v211_v42 = vpop.xlane.xlu1 %210  ;;  %v209_v9 = vpop.xlane.xlu0 %208  ;;  %v2233_v12 = vld [vmem:[#allocation7 + $0x38] sm:$0xff]  }
  0xfd   :  { %v2283_v17 = vpop.eup %2282  ;;  %2012 = vmatprep.subr.bf16.mxu1 %v324_v63  ;;  %v247_v15 = vmax.f32 %v211_v42, 1e-24  ;;  %v246_v18 = vmax.f32 %v209_v9, 1e-24  ;;  %v325_v16 = vpack.c.bf16 %v303_v1, %v302_v41  ;;  %2058 = vmatprep.subr.bf16.mxu0 %v2233_v12 }
  0xfe   :  { %v2285_v19 = vpop.eup %2284  ;;  %v305_v24 = vmul.f32 %v2283_v17, %v2563_v51  ;;  %v2643_v51 = vld [vmem:[#allocation2 + $0x18] sm:$0xff]   ;;  %2059 = vmatpush3.bf16.msra.mxu0 %v2233_v12  ;;  %v2234_v12 = vld [vmem:[#allocation7 + $0x40] sm:$0xff]  }
  0xff   :  { %1997 = vmatmul.mubr.bf16.vlgmr.msra.gmra.mrb[0].mxu1 %v2633_v8  ;;  %2294 = vrsqrt.f32 %v247_v15  ;;  %v304_v46 = vmul.f32 %v2285_v19, %v2565_v52  ;;  %2156 = vmatprep.subr.bf16.mxu0 %v2234_v12 }
 0x100   :  { %2013 = vmatpush3.bf16.msra.mxu1 %v324_v63  ;;  %2296 = vrsqrt.f32 %v246_v18  ;;  %v215_v47 = vpop.xlane.xlu1 %214  ;;  %v213_v25 = vpop.xlane.xlu0 %212  ;;  %2000 = vmatprep.mubr.bf16.mxu1 %v2636_v10 }
 0x101   :  { %v2287_v29 = vpop.eup %2286  ;;  %2014 = vmatprep.subr.bf16.mxu1 %v325_v16  ;;  %v249_v30 = vmax.f32 %v215_v47, 1e-24  ;;  %v248_v22 = vmax.f32 %v213_v25, 1e-24  ;;  %v326_v31 = vpack.c.bf16 %v305_v24, %v304_v46 }
 0x102   :  { %v2289_v23 = vpop.eup %2288  ;;  %v307_v34 = vmul.f32 %v2287_v29, %v2571_v56 }
 0x103   :  { %2298 = vrsqrt.f32 %v249_v30  ;;  %v306_v35 = vmul.f32 %v2289_v23, %v2573_v57 }
 0x104   :  { %2015 = vmatpush3.bf16.msra.mxu1 %v325_v16  ;;  %2300 = vrsqrt.f32 %v248_v22  ;;  %v219_v52 = vpop.xlane.xlu1 %218  ;;  %v217_v38 = vpop.xlane.xlu0 %216 }
 0x105   :  { %v2291_v40 = vpop.eup %2290  ;;  %2016 = vmatprep.subr.bf16.mxu1 %v326_v31  ;;  %v251_v43 = vmax.f32 %v219_v52, 1e-24  ;;  %v250_v27 = vmax.f32 %v217_v38, 1e-24  ;;  %v327_v44 = vpack.c.bf16 %v307_v34, %v306_v35 }
 0x106   :  { %v2293_v28 = vpop.eup %2292  ;;  %v309_v45 = vmul.f32 %v2291_v40, %v2579_v61  ;;  %v2656_v61 = vld [vmem:[#allocation2 + $0x30] sm:$0xff]  }
 0x107   :  { %2001 = vmatmul.mubr.bf16.gmra.mrb[4].mxu1 %v2643_v51  ;;  %2302 = vrsqrt.f32 %v251_v43  ;;  %v308_v56 = vmul.f32 %v2293_v28, %v2581_v62 }
 0x108   :  { %2017 = vmatpush3.bf16.msra.mxu1 %v326_v31  ;;  %2304 = vrsqrt.f32 %v250_v27  ;;  %2004 = vmatprep.mubr.bf16.mxu1 %v2646_v39 }
 0x109   :  { %v2295_v57 = vpop.eup %2294  ;;  %2018 = vmatprep.subr.bf16.mxu1 %v327_v44  ;;  %v328_v48 = vpack.c.bf16 %v309_v45, %v308_v56 }
 0x10a   :  { %v2297_v2 = vpop.eup %2296  ;;  %v311_v49 = vmul.f32 %v2295_v57, %v2587_v6 }
 0x10b   :  { %v310_v5 = vmul.f32 %v2297_v2, %v2589_v7 }
 0x10c   :  { %2019 = vmatpush3.bf16.msra.mxu1 %v327_v44 }
 0x10d   :  { %v2299_v32 = vpop.eup %2298  ;;  %2020 = vmatprep.subr.bf16.mxu1 %v328_v48  ;;  %v329_v62 = vpack.c.bf16 %v311_v49, %v310_v5 }
 0x10e   :  { %v2301_v4 = vpop.eup %2300  ;;  %v313_v33 = vmul.f32 %v2299_v32, %v2595_v13 }
 0x10f   :  { %2005 = vmatmul.mubr.bf16.gmra.mrb[8].mxu1 %v2653_v3  ;;  %v312_v50 = vmul.f32 %v2301_v4, %v2597_v14  ;;  %v2670_v14 = vld [vmem:[#allocation2 + $0x48] sm:$0xff]  }
 0x110   :  { %2021 = vmatpush3.bf16.msra.mxu1 %v328_v48  ;;  %2008 = vmatprep.mubr.bf16.mxu1 %v2656_v61 }
 0x111   :  { %v2303_v6 = vpop.eup %2302  ;;  %2022 = vmatprep.subr.bf16.mxu1 %v329_v62  ;;  %v330_v53 = vpack.c.bf16 %v313_v33, %v312_v50 }
 0x112   :  { %v2305_v7 = vpop.eup %2304  ;;  %v315_v54 = vmul.f32 %v2303_v6, %v2603_v20  ;;  %v2676_v20 = vld [vmem:[#allocation2 + $0x58] sm:$0xff]  }
 0x113   :  { %v314_v58 = vmul.f32 %v2305_v7, %v2605_v21  ;;  %v2678_v21 = vld [vmem:[#allocation2 + $0x60] sm:$0xff]  }
 0x114   :  { %2023 = vmatpush3.bf16.msra.mxu1 %v329_v62 }
 0x115   :  { %2024 = vmatprep.subr.bf16.mxu1 %v330_v53  ;;  %v331_v13 = vpack.c.bf16 %v315_v54, %v314_v58 }
 0x117   :  { %2009 = vmatmul.mubr.bf16.gmra.mrb[12].mxu1 %v2663_v55 }
 0x118   :  { %2025 = vmatpush3.bf16.msra.mxu1 %v330_v53  ;;  %2028 = vmatprep.mubr.bf16.mxu1 %v2666_v11 }
 0x119   :  { %2026 = vmatprep.subr.bf16.mxu1 %v331_v13 }
 0x11c   :  { %2027 = vmatpush3.bf16.msra.mxu1 %v331_v13 }
 0x11f   :  { %2029 = vmatmul.mubr.bf16.vlgmr.msra.gmra.mrb[16].mxu1 %v2670_v14 }
 0x120   :  { %2032 = vmatprep.mubr.bf16.mxu1 %v2672_v36 }
 0x127   :  { %2033 = vmatmul.mubr.bf16.gmra.mrb[20].mxu1 %v2676_v20 }
 0x128   :  { %2036 = vmatprep.mubr.bf16.mxu1 %v2678_v21 }
 0x12f   :  { %2037 = vmatmul.mubr.bf16.gmra.mrb[24].mxu1 %v2682_v59 }
 0x130   :  { %2040 = vmatprep.mubr.bf16.mxu1 %v2684_v37 }
 0x137   :  { %2041 = vmatmul.mubr.bf16.gmra.mrb[28].mxu1 %v2688_v60 }
 0x138   :  { %2108 = vmatprep.mubr.bf16.mxu1 %v2611_v26 }
 0x1d2   :  { %v1998_v63 = vpop.f32.mrb[0].mxu1 }
 0x1d3   :  { %v447_v0 = vpop.f32.mrb[1].mxu1 }
 0x1d4   :  { %v1999_v1 = vpop.f32.mrb[2].mxu1 }
 0x1d5   :  { %v656_v41 = vpack.c.bf16 %v1999_v1, %v1998_v63  ;;  %v450_v42 = vpop.f32.mrb[3].mxu1  ;;  %v2235_v63 = vld [vmem:[#allocation7 + $0x48] sm:$0xff]   ;;  %v2237_v1 = vld [vmem:[#allocation7 + $0x58] sm:$0xff]  }
 0x1d6   :  { %v655_v9 = vpack.c.bf16 %v450_v42, %v447_v0  ;;  %v2236_v0 = vld [vmem:[#allocation7 + $0x50] sm:$0xff]   ;;  %v687_v42 = vlaneseq }
 0x1d8   :  { %2060 = vmatprep.mubr.bf16.mxu0 %v655_v9  ;;  %v2239_v9 = vld [vmem:[#allocation7 + $0x68] sm:$0xff]  }
 0x1d9   :  { %2061 = vmatmul.mubr.bf16.vlgmr.msra.gmra.mrb[0].mxu0 %v656_v41  ;;  %v2238_v41 = vld [vmem:[#allocation7 + $0x60] sm:$0xff]  }
 0x1da   :  { %v2002_v17 = vpop.f32.mrb[4].mxu1  ;;  %2157 = vmatpush3.bf16.msra.mxu0 %v2234_v12 }
 0x1db   :  { %v463_v15 = vpop.f32.mrb[5].mxu1  ;;  %2158 = vmatprep.subr.bf16.mxu0 %v2235_v63 }
 0x1dc   :  { %v2003_v18 = vpop.f32.mrb[6].mxu1 }
 0x1dd   :  { %v658_v16 = vpack.c.bf16 %v2003_v18, %v2002_v17  ;;  %v466_v19 = vpop.f32.mrb[7].mxu1  ;;  %v2692_v17 = vshrl.u32 %v687_v42, 7 }
 0x1de   :  { %v657_v24 = vpack.c.bf16 %v466_v19, %v463_v15  ;;  %2159 = vmatpush3.bf16.msra.mxu0 %v2235_v63  ;;  %v2240_v15 = vld [vmem:[#allocation7 + $0x70] sm:$0xff]   ;;  %v2241_v19 = vld [vmem:[#allocation7 + $0x78] sm:$0xff]  }
 0x1df   :  { %2160 = vmatprep.subr.bf16.mxu0 %v2236_v0  ;;  %v689_v18 = vsub.s32 0, %v2692_v17 }
 0x1e0   :  { %2064 = vmatprep.mubr.bf16.mxu0 %v657_v24 }
 0x1e1   :  { %2065 = vmatmul.mubr.bf16.gmra.mrb[4].mxu0 %v658_v16  ;;  %v2698_v16 = vld [vmem:[%s2804_s3] sm:$0x3]  ;;  %s2405_s3 = smov [#allocation8]  }
 0x1e2   :  { %v2006_v26 = vpop.f32.mrb[8].mxu1  ;;  %2161 = vmatpush3.bf16.msra.mxu0 %v2236_v0  ;;  %v2701_v24 = vrot.slane %v2698_v16, %v689_v18  ;;  %s1585_s26 = sshll.u32 %s2405_s3, 4  ;;  %s1586_s26 = int_to_ptr.vmem [resolvable:$true] %s1585_s26 }
 0x1e3   :  { %v479_v46 = vpop.f32.mrb[9].mxu1  ;;  %2162 = vmatprep.subr.bf16.mxu0 %v2237_v1  ;;  %s2372_s29 = scalar_lea.vmem %s1586_s26, 2048  ;;  %p2377_p11 = scmp.lt.s32.totalorder %s1586_s26, %s1586_s26 }
 0x1e4   :  { %v2007_v47 = vpop.f32.mrb[10].mxu1  ;;  %p2373_p10 = scmp.ne.s32.totalorder %s1586_s26, %s2372_s29  ;;  %p2378_p12 = scmp.lt.s32.totalorder %s2372_s29, %s2372_s29 }
 0x1e5   :  { %v660_v25 = vpack.c.bf16 %v2007_v47, %v2006_v26  ;;  %v482_v29 = vpop.f32.mrb[11].mxu1 }
 0x1e6   :  { %v659_v30 = vpack.c.bf16 %v482_v29, %v479_v46  ;;  %2163 = vmatpush3.bf16.msra.mxu0 %v2237_v1  ;;  %p2379_p13 = por %p2378_p12, %p2377_p11 }
 0x1e7   :  { %2164 = vmatprep.subr.bf16.mxu0 %v2238_v41 }
 0x1e8   :  { %2068 = vmatprep.mubr.bf16.mxu0 %v659_v30  ;;  %p2380_p0 = pnand %p2379_p13, %p2373_p10 }
 0x1e9   :  { %2069 = vmatmul.mubr.bf16.gmra.mrb[8].mxu0 %v660_v25 }
 0x1ea   :  { %v2010_v22 = vpop.f32.mrb[12].mxu1  ;;  %2165 = vmatpush3.bf16.msra.mxu0 %v2238_v41 }
 0x1eb   :  { %v495_v31 = vpop.f32.mrb[13].mxu1  ;;  %2166 = vmatprep.subr.bf16.mxu0 %v2239_v9 }
 0x1ec   :  { %v2011_v23 = vpop.f32.mrb[14].mxu1 }
 0x1ed   :  { %v662_v34 = vpack.c.bf16 %v2011_v23, %v2010_v22  ;;  %v498_v35 = vpop.f32.mrb[15].mxu1 }
 0x1ee   :  { %v661_v52 = vpack.c.bf16 %v498_v35, %v495_v31  ;;  %2167 = vmatpush3.bf16.msra.mxu0 %v2239_v9 }
 0x1ef   :  { %2168 = vmatprep.subr.bf16.mxu0 %v2240_v15 }
 0x1f0   :  { %2072 = vmatprep.mubr.bf16.mxu0 %v661_v52 }
 0x1f1   :  { %2073 = vmatmul.mubr.bf16.gmra.mrb[12].mxu0 %v662_v34 }
 0x1f2   :  { %v2030_v38 = vpop.f32.mrb[16].mxu1  ;;  %2169 = vmatpush3.bf16.msra.mxu0 %v2240_v15 }
 0x1f3   :  { %v592_v40 = vpop.f32.mrb[17].mxu1  ;;  %2170 = vmatprep.subr.bf16.mxu0 %v2241_v19 }
 0x1f4   :  { %v2031_v43 = vpop.f32.mrb[18].mxu1 }
 0x1f5   :  { %v664_v27 = vpack.c.bf16 %v2031_v43, %v2030_v38  ;;  %v595_v44 = vpop.f32.mrb[19].mxu1 }
 0x1f6   :  { %v663_v28 = vpack.c.bf16 %v595_v44, %v592_v40  ;;  %2171 = vmatpush3.bf16.msra.mxu0 %v2241_v19 }
 0x1f8   :  { %2076 = vmatprep.mubr.bf16.mxu0 %v663_v28 }
 0x1f9   :  { %2077 = vmatmul.mubr.bf16.gmra.mrb[16].mxu0 %v664_v27 }
 0x1fa   :  { %v2034_v45 = vpop.f32.mrb[20].mxu1 }
 0x1fb   :  { %v608_v56 = vpop.f32.mrb[21].mxu1 }
 0x1fc   :  { %v2035_v57 = vpop.f32.mrb[22].mxu1 }
 0x1fd   :  { %v666_v48 = vpack.c.bf16 %v2035_v57, %v2034_v45  ;;  %v611_v2 = vpop.f32.mrb[23].mxu1 }
 0x1fe   :  { %v665_v49 = vpack.c.bf16 %v611_v2, %v608_v56 }
 0x200   :  { %2080 = vmatprep.mubr.bf16.mxu0 %v665_v49 }
 0x201   :  { %2081 = vmatmul.mubr.bf16.gmra.mrb[20].mxu0 %v666_v48 }
 0x202   :  { %v2038_v5 = vpop.f32.mrb[24].mxu1 }
 0x203   :  { %v624_v32 = vpop.f32.mrb[25].mxu1 }
 0x204   :  { %v2039_v62 = vpop.f32.mrb[26].mxu1 }
 0x205   :  { %v668_v4 = vpack.c.bf16 %v2039_v62, %v2038_v5  ;;  %v627_v33 = vpop.f32.mrb[27].mxu1 }
 0x206   :  { %v667_v50 = vpack.c.bf16 %v627_v33, %v624_v32 }
 0x208   :  { %2084 = vmatprep.mubr.bf16.mxu0 %v667_v50 }
 0x209   :  { %2085 = vmatmul.mubr.bf16.gmra.mrb[24].mxu0 %v668_v4 }
 0x20a   :  { %v2042_v6 = vpop.f32.mrb[28].mxu1 }
 0x20b   :  { %v640_v53 = vpop.f32.mrb[29].mxu1 }
 0x20c   :  { %v2043_v7 = vpop.f32.mrb[30].mxu1 }
 0x20d   :  { %v670_v54 = vpack.c.bf16 %v2043_v7, %v2042_v6  ;;  %v643_v58 = vpop.f32.mrb[31].mxu1 }
 0x20e   :  { %v669_v13 = vpack.c.bf16 %v643_v58, %v640_v53 }
 0x210   :  { %2088 = vmatprep.mubr.bf16.mxu0 %v669_v13 }
 0x211   :  { %2089 = vmatmul.mubr.bf16.gmra.mrb[28].mxu0 %v670_v54 }
 0x2ac   :  { %v2062_v26 = vpop.f32.mrb[0].mxu0 }
 0x2ad   :  { %v782_v46 = vadd.f32 %v2062_v26, %v2701_v24  ;;  %v773_v47 = vpop.f32.mrb[1].mxu0 }
 0x2ae   :  { %v774_v25 = vadd.f32 %v773_v47, %v2701_v24  ;;  %v2063_v29 = vpop.f32.mrb[2].mxu0 }
 0x2af   :  { %v785_v30 = vadd.f32 %v2063_v29, %v2701_v24  ;;  %v776_v22 = vpop.f32.mrb[3].mxu0  ;;  %v902_v23 = vmax.f32 %v782_v46, 0.0 }
 0x2b0   :  { %v777_v31 = vadd.f32 %v776_v22, %v2701_v24  ;;  %v900_v35 = vmax.f32 %v774_v25, 0.0 }
 0x2b1   :  { %v903_v34 = vmax.f32 %v785_v30, 0.0 }
 0x2b2   :  { %v901_v52 = vmax.f32 %v777_v31, 0.0 }
 0x2b3   :  { %v933_v38 = vpack.c.bf16 %v903_v34, %v902_v23 }
 0x2b4   :  { %v932_v40 = vpack.c.bf16 %v901_v52, %v900_v35  ;;  %v2066_v43 = vpop.f32.mrb[4].mxu0 }
 0x2b5   :  { %v798_v27 = vadd.f32 %v2066_v43, %v2701_v24  ;;  %v789_v44 = vpop.f32.mrb[5].mxu0 }
 0x2b6   :  { %v790_v28 = vadd.f32 %v789_v44, %v2701_v24  ;;  %v2067_v45 = vpop.f32.mrb[6].mxu0  ;;  %2092 = vmatprep.subr.bf16.mxu1 %v932_v40 }
 0x2b7   :  { %v801_v56 = vadd.f32 %v2067_v45, %v2701_v24  ;;  %v792_v57 = vpop.f32.mrb[7].mxu0  ;;  %2093 = vmatpush3.bf16.msra.mxu1 %v932_v40  ;;  %v906_v2 = vmax.f32 %v798_v27, 0.0 }
 0x2b8   :  { %v793_v48 = vadd.f32 %v792_v57, %v2701_v24  ;;  %2094 = vmatprep.subr.bf16.mxu1 %v933_v38  ;;  %v904_v5 = vmax.f32 %v790_v28, 0.0 }
 0x2b9   :  { %v907_v49 = vmax.f32 %v801_v56, 0.0 }
 0x2ba   :  { %v905_v32 = vmax.f32 %v793_v48, 0.0 }
 0x2bb   :  { %v935_v62 = vpack.c.bf16 %v907_v49, %v906_v2  ;;  %2095 = vmatpush3.bf16.msra.mxu1 %v933_v38 }
 0x2bc   :  { %v934_v4 = vpack.c.bf16 %v905_v32, %v904_v5  ;;  %v2070_v33 = vpop.f32.mrb[8].mxu0 }
 0x2bd   :  { %v814_v50 = vadd.f32 %v2070_v33, %v2701_v24  ;;  %v805_v6 = vpop.f32.mrb[9].mxu0 }
 0x2be   :  { %v806_v53 = vadd.f32 %v805_v6, %v2701_v24  ;;  %v2071_v7 = vpop.f32.mrb[10].mxu0  ;;  %2096 = vmatprep.subr.bf16.mxu1 %v934_v4 }
 0x2bf   :  { %v817_v54 = vadd.f32 %v2071_v7, %v2701_v24  ;;  %v808_v58 = vpop.f32.mrb[11].mxu0  ;;  %2097 = vmatpush3.bf16.msra.mxu1 %v934_v4  ;;  %v910_v12 = vmax.f32 %v814_v50, 0.0 }
 0x2c0   :  { %v809_v13 = vadd.f32 %v808_v58, %v2701_v24  ;;  %2098 = vmatprep.subr.bf16.mxu1 %v935_v62  ;;  %v908_v0 = vmax.f32 %v806_v53, 0.0 }
 0x2c1   :  { %v911_v63 = vmax.f32 %v817_v54, 0.0 }
 0x2c2   :  { %v909_v1 = vmax.f32 %v809_v13, 0.0 }
 0x2c3   :  { %v937_v41 = vpack.c.bf16 %v911_v63, %v910_v12  ;;  %2099 = vmatpush3.bf16.msra.mxu1 %v935_v62 }
 0x2c4   :  { %v936_v42 = vpack.c.bf16 %v909_v1, %v908_v0  ;;  %v2074_v9 = vpop.f32.mrb[12].mxu0 }
 0x2c5   :  { %v830_v15 = vadd.f32 %v2074_v9, %v2701_v24  ;;  %v821_v18 = vpop.f32.mrb[13].mxu0 }
 0x2c6   :  { %v822_v19 = vadd.f32 %v821_v18, %v2701_v24  ;;  %v2075_v26 = vpop.f32.mrb[14].mxu0  ;;  %2100 = vmatprep.subr.bf16.mxu1 %v936_v42 }
 0x2c7   :  { %v833_v46 = vadd.f32 %v2075_v26, %v2701_v24  ;;  %v824_v47 = vpop.f32.mrb[15].mxu0  ;;  %2101 = vmatpush3.bf16.msra.mxu1 %v936_v42  ;;  %v914_v29 = vmax.f32 %v830_v15, 0.0 }
 0x2c8   :  { %v825_v25 = vadd.f32 %v824_v47, %v2701_v24  ;;  %2102 = vmatprep.subr.bf16.mxu1 %v937_v41  ;;  %v912_v22 = vmax.f32 %v822_v19, 0.0 }
 0x2c9   :  { %v915_v30 = vmax.f32 %v833_v46, 0.0 }
 0x2ca   :  { %v913_v31 = vmax.f32 %v825_v25, 0.0 }
 0x2cb   :  { %v939_v23 = vpack.c.bf16 %v915_v30, %v914_v29  ;;  %2103 = vmatpush3.bf16.msra.mxu1 %v937_v41 }
 0x2cc   :  { %v938_v34 = vpack.c.bf16 %v913_v31, %v912_v22  ;;  %v2078_v35 = vpop.f32.mrb[16].mxu0 }
 0x2cd   :  { %v846_v52 = vadd.f32 %v2078_v35, %v2701_v24  ;;  %v837_v38 = vpop.f32.mrb[17].mxu0 }
 0x2ce   :  { %v838_v40 = vadd.f32 %v837_v38, %v2701_v24  ;;  %v2079_v43 = vpop.f32.mrb[18].mxu0  ;;  %2104 = vmatprep.subr.bf16.mxu1 %v938_v34 }
 0x2cf   :  { %v849_v27 = vadd.f32 %v2079_v43, %v2701_v24  ;;  %v840_v44 = vpop.f32.mrb[19].mxu0  ;;  %2105 = vmatpush3.bf16.msra.mxu1 %v938_v34  ;;  %v918_v45 = vmax.f32 %v846_v52, 0.0 }
 0x2d0   :  { %v841_v28 = vadd.f32 %v840_v44, %v2701_v24  ;;  %2106 = vmatprep.subr.bf16.mxu1 %v939_v23  ;;  %v916_v57 = vmax.f32 %v838_v40, 0.0 }
 0x2d1   :  { %v919_v56 = vmax.f32 %v849_v27, 0.0 }
 0x2d2   :  { %v917_v48 = vmax.f32 %v841_v28, 0.0 }
 0x2d3   :  { %v941_v2 = vpack.c.bf16 %v919_v56, %v918_v45  ;;  %2107 = vmatpush3.bf16.msra.mxu1 %v939_v23 }
 0x2d4   :  { %v940_v49 = vpack.c.bf16 %v917_v48, %v916_v57  ;;  %v2082_v5 = vpop.f32.mrb[20].mxu0 }
 0x2d5   :  { %v862_v32 = vadd.f32 %v2082_v5, %v2701_v24  ;;  %v853_v62 = vpop.f32.mrb[21].mxu0 }
 0x2d6   :  { %v854_v4 = vadd.f32 %v853_v62, %v2701_v24  ;;  %v2083_v33 = vpop.f32.mrb[22].mxu0  ;;  %2109 = vmatmul.mubr.bf16.vlgmr.msra.gmra.mrb[32].mxu1 %v2633_v8  ;;  %2124 = vmatprep.subr.bf16.mxu1 %v940_v49 }
 0x2d7   :  { %v865_v50 = vadd.f32 %v2083_v33, %v2701_v24  ;;  %v856_v6 = vpop.f32.mrb[23].mxu0  ;;  %2125 = vmatpush3.bf16.msra.mxu1 %v940_v49  ;;  %2112 = vmatprep.mubr.bf16.mxu1 %v2636_v10  ;;  %v922_v7 = vmax.f32 %v862_v32, 0.0 }
 0x2d8   :  { %v857_v53 = vadd.f32 %v856_v6, %v2701_v24  ;;  %2126 = vmatprep.subr.bf16.mxu1 %v941_v2  ;;  %v920_v58 = vmax.f32 %v854_v4, 0.0 }
 0x2d9   :  { %v923_v54 = vmax.f32 %v865_v50, 0.0 }
 0x2da   :  { %v921_v13 = vmax.f32 %v857_v53, 0.0 }
 0x2db   :  { %v943_v12 = vpack.c.bf16 %v923_v54, %v922_v7  ;;  %2127 = vmatpush3.bf16.msra.mxu1 %v941_v2 }
 0x2dc   :  { %v942_v63 = vpack.c.bf16 %v921_v13, %v920_v58  ;;  %v2086_v0 = vpop.f32.mrb[24].mxu0 }
 0x2dd   :  { %v878_v8 = vadd.f32 %v2086_v0, %v2701_v24  ;;  %v869_v1 = vpop.f32.mrb[25].mxu0 }
 0x2de   :  { %v870_v41 = vadd.f32 %v869_v1, %v2701_v24  ;;  %v2087_v42 = vpop.f32.mrb[26].mxu0  ;;  %2113 = vmatmul.mubr.bf16.gmra.mrb[36].mxu1 %v2643_v51  ;;  %2128 = vmatprep.subr.bf16.mxu1 %v942_v63 }
 0x2df   :  { %v881_v10 = vadd.f32 %v2087_v42, %v2701_v24  ;;  %v872_v9 = vpop.f32.mrb[27].mxu0  ;;  %2129 = vmatpush3.bf16.msra.mxu1 %v942_v63  ;;  %2116 = vmatprep.mubr.bf16.mxu1 %v2646_v39  ;;  %v926_v18 = vmax.f32 %v878_v8, 0.0 }
 0x2e0   :  { %v873_v15 = vadd.f32 %v872_v9, %v2701_v24  ;;  %2130 = vmatprep.subr.bf16.mxu1 %v943_v12  ;;  %v924_v26 = vmax.f32 %v870_v41, 0.0 }
 0x2e1   :  { %v927_v19 = vmax.f32 %v881_v10, 0.0 }
 0x2e2   :  { %v925_v46 = vmax.f32 %v873_v15, 0.0 }
 0x2e3   :  { %v945_v47 = vpack.c.bf16 %v927_v19, %v926_v18  ;;  %2131 = vmatpush3.bf16.msra.mxu1 %v943_v12 }
 0x2e4   :  { %v944_v25 = vpack.c.bf16 %v925_v46, %v924_v26  ;;  %v2090_v29 = vpop.f32.mrb[28].mxu0 }
 0x2e5   :  { %v894_v51 = vadd.f32 %v2090_v29, %v2701_v24  ;;  %v885_v30 = vpop.f32.mrb[29].mxu0  ;;  %v1177_v29 = vsub.s32 1, %v2692_v17 }
 0x2e6   :  { %v886_v22 = vadd.f32 %v885_v30, %v2701_v24  ;;  %v2091_v31 = vpop.f32.mrb[30].mxu0  ;;  %2117 = vmatmul.mubr.bf16.gmra.mrb[40].mxu1 %v2653_v3  ;;  %2132 = vmatprep.subr.bf16.mxu1 %v944_v25 }
 0x2e7   :  { %v897_v39 = vadd.f32 %v2091_v31, %v2701_v24  ;;  %v888_v23 = vpop.f32.mrb[31].mxu0  ;;  %2133 = vmatpush3.bf16.msra.mxu1 %v944_v25  ;;  %2120 = vmatprep.mubr.bf16.mxu1 %v2656_v61  ;;  %v930_v35 = vmax.f32 %v894_v51, 0.0  ;;  %v2752_v51 = vrot.slane %v2698_v16, %v1177_v29 }
 0x2e8   :  { %v889_v34 = vadd.f32 %v888_v23, %v2701_v24  ;;  %2134 = vmatprep.subr.bf16.mxu1 %v945_v47  ;;  %v928_v38 = vmax.f32 %v886_v22, 0.0 }
 0x2e9   :  { %v931_v52 = vmax.f32 %v897_v39, 0.0 }
 0x2ea   :  { %v929_v40 = vmax.f32 %v889_v34, 0.0 }
 0x2eb   :  { %v947_v43 = vpack.c.bf16 %v931_v52, %v930_v35  ;;  %2135 = vmatpush3.bf16.msra.mxu1 %v945_v47 }
 0x2ec   :  { %v946_v27 = vpack.c.bf16 %v929_v40, %v928_v38 }
 0x2ee   :  { %2121 = vmatmul.mubr.bf16.gmra.mrb[44].mxu1 %v2663_v55  ;;  %2136 = vmatprep.subr.bf16.mxu1 %v946_v27 }
 0x2ef   :  { %2137 = vmatpush3.bf16.msra.mxu1 %v946_v27  ;;  %2140 = vmatprep.mubr.bf16.mxu1 %v2666_v11 }
 0x2f0   :  { %2138 = vmatprep.subr.bf16.mxu1 %v947_v43 }
 0x2f3   :  { %2139 = vmatpush3.bf16.msra.mxu1 %v947_v43 }
 0x2f6   :  { %2141 = vmatmul.mubr.bf16.vlgmr.msra.gmra.mrb[48].mxu1 %v2670_v14 }
 0x2f7   :  { %2144 = vmatprep.mubr.bf16.mxu1 %v2672_v36 }
 0x2fe   :  { %2145 = vmatmul.mubr.bf16.gmra.mrb[52].mxu1 %v2676_v20 }
 0x2ff   :  { %2148 = vmatprep.mubr.bf16.mxu1 %v2678_v21 }
 0x306   :  { %2149 = vmatmul.mubr.bf16.gmra.mrb[56].mxu1 %v2682_v59 }
 0x307   :  { %2152 = vmatprep.mubr.bf16.mxu1 %v2684_v37 }
 0x30e   :  { %2153 = vmatmul.mubr.bf16.gmra.mrb[60].mxu1 %v2688_v60 }
 0x3a9   :  { %v2110_v3 = vpop.f32.mrb[32].mxu1 }
 0x3aa   :  { %v982_v61 = vpop.f32.mrb[33].mxu1 }
 0x3ab   :  { %v2111_v55 = vpop.f32.mrb[34].mxu1 }
 0x3ac   :  { %v1143_v11 = vpack.c.bf16 %v2111_v55, %v2110_v3  ;;  %v985_v24 = vpop.f32.mrb[35].mxu1 }
 0x3ad   :  { %v1142_v44 = vpack.c.bf16 %v985_v24, %v982_v61 }
 0x3af   :  { %2172 = vmatprep.mubr.bf16.mxu0 %v1142_v44 }
 0x3b0   :  { %2173 = vmatmul.mubr.bf16.vlgmr.msra.gmra.mrb[32].mxu0 %v1143_v11 }
 0x3b1   :  { %v2114_v14 = vpop.f32.mrb[36].mxu1 }
 0x3b2   :  { %v998_v36 = vpop.f32.mrb[37].mxu1 }
 0x3b3   :  { %v2115_v28 = vpop.f32.mrb[38].mxu1 }
 0x3b4   :  { %v1145_v20 = vpack.c.bf16 %v2115_v28, %v2114_v14  ;;  %v1001_v45 = vpop.f32.mrb[39].mxu1 }
 0x3b5   :  { %v1144_v21 = vpack.c.bf16 %v1001_v45, %v998_v36 }
 0x3b7   :  { %2176 = vmatprep.mubr.bf16.mxu0 %v1144_v21 }
 0x3b8   :  { %2177 = vmatmul.mubr.bf16.gmra.mrb[36].mxu0 %v1145_v20 }
 0x3b9   :  { %v2118_v59 = vpop.f32.mrb[40].mxu1 }
 0x3ba   :  { %v1014_v37 = vpop.f32.mrb[41].mxu1 }
 0x3bb   :  { %v2119_v56 = vpop.f32.mrb[42].mxu1 }
 0x3bc   :  { %v1147_v60 = vpack.c.bf16 %v2119_v56, %v2118_v59  ;;  %v1017_v57 = vpop.f32.mrb[43].mxu1 }
 0x3bd   :  { %v1146_v48 = vpack.c.bf16 %v1017_v57, %v1014_v37 }
 0x3bf   :  { %2180 = vmatprep.mubr.bf16.mxu0 %v1146_v48 }
 0x3c0   :  { %2181 = vmatmul.mubr.bf16.gmra.mrb[40].mxu0 %v1147_v60 }
 0x3c1   :  { %v2122_v2 = vpop.f32.mrb[44].mxu1 }
 0x3c2   :  { %v1030_v49 = vpop.f32.mrb[45].mxu1 }
 0x3c3   :  { %v2123_v5 = vpop.f32.mrb[46].mxu1 }
 0x3c4   :  { %v1149_v32 = vpack.c.bf16 %v2123_v5, %v2122_v2  ;;  %v1033_v62 = vpop.f32.mrb[47].mxu1 }
 0x3c5   :  { %v1148_v4 = vpack.c.bf16 %v1033_v62, %v1030_v49 }
 0x3c7   :  { %2184 = vmatprep.mubr.bf16.mxu0 %v1148_v4 }
 0x3c8   :  { %2185 = vmatmul.mubr.bf16.gmra.mrb[44].mxu0 %v1149_v32 }
 0x3c9   :  { %v2142_v33 = vpop.f32.mrb[48].mxu1 }
 0x3ca   :  { %v1079_v50 = vpop.f32.mrb[49].mxu1 }
 0x3cb   :  { %v2143_v6 = vpop.f32.mrb[50].mxu1 }
 0x3cc   :  { %v1151_v53 = vpack.c.bf16 %v2143_v6, %v2142_v33  ;;  %v1082_v7 = vpop.f32.mrb[51].mxu1 }
 0x3cd   :  { %v1150_v54 = vpack.c.bf16 %v1082_v7, %v1079_v50 }
 0x3cf   :  { %2188 = vmatprep.mubr.bf16.mxu0 %v1150_v54 }
 0x3d0   :  { %2189 = vmatmul.mubr.bf16.gmra.mrb[48].mxu0 %v1151_v53 }
 0x3d1   :  { %v2146_v58 = vpop.f32.mrb[52].mxu1 }
 0x3d2   :  { %v1095_v13 = vpop.f32.mrb[53].mxu1 }
 0x3d3   :  { %v2147_v12 = vpop.f32.mrb[54].mxu1 }
 0x3d4   :  { %v1153_v63 = vpack.c.bf16 %v2147_v12, %v2146_v58  ;;  %v1098_v0 = vpop.f32.mrb[55].mxu1 }
 0x3d5   :  { %v1152_v8 = vpack.c.bf16 %v1098_v0, %v1095_v13 }
 0x3d7   :  { %2192 = vmatprep.mubr.bf16.mxu0 %v1152_v8 }
 0x3d8   :  { %2193 = vmatmul.mubr.bf16.gmra.mrb[52].mxu0 %v1153_v63 }
 0x3d9   :  { %v2150_v1 = vpop.f32.mrb[56].mxu1 }
 0x3da   :  { %v1111_v41 = vpop.f32.mrb[57].mxu1 }
 0x3db   :  { %v2151_v42 = vpop.f32.mrb[58].mxu1 }
 0x3dc   :  { %v1155_v10 = vpack.c.bf16 %v2151_v42, %v2150_v1  ;;  %v1114_v9 = vpop.f32.mrb[59].mxu1 }
 0x3dd   :  { %v1154_v15 = vpack.c.bf16 %v1114_v9, %v1111_v41 }
 0x3df   :  { %2196 = vmatprep.mubr.bf16.mxu0 %v1154_v15 }
 0x3e0   :  { %2197 = vmatmul.mubr.bf16.gmra.mrb[56].mxu0 %v1155_v10 }
 0x3e1   :  { %v2154_v18 = vpop.f32.mrb[60].mxu1 }
 0x3e2   :  { %v1127_v19 = vpop.f32.mrb[61].mxu1 }
 0x3e3   :  { %v2155_v26 = vpop.f32.mrb[62].mxu1 }
 0x3e4   :  { %v1157_v46 = vpack.c.bf16 %v2155_v26, %v2154_v18  ;;  %v1130_v47 = vpop.f32.mrb[63].mxu1 }
 0x3e5   :  { %v1156_v25 = vpack.c.bf16 %v1130_v47, %v1127_v19 }
 0x3e7   :  { %2200 = vmatprep.mubr.bf16.mxu0 %v1156_v25 }
 0x3e8   :  { %2201 = vmatmul.mubr.bf16.gmra.mrb[60].mxu0 %v1157_v46 }
 0x483   :  { %v2174_v30 = vpop.f32.mrb[32].mxu0 }
 0x484   :  { %v1270_v22 = vadd.f32 %v2174_v30, %v2752_v51  ;;  %v1261_v31 = vpop.f32.mrb[33].mxu0 }
 0x485   :  { %v1262_v39 = vadd.f32 %v1261_v31, %v2752_v51  ;;  %v2175_v23 = vpop.f32.mrb[34].mxu0 }
 0x486   :  { %v1273_v34 = vadd.f32 %v2175_v23, %v2752_v51  ;;  %v1264_v35 = vpop.f32.mrb[35].mxu0  ;;  %v1390_v38 = vmax.f32 %v1270_v22, 0.0 }
 0x487   :  { %v1265_v52 = vadd.f32 %v1264_v35, %v2752_v51  ;;  %v1388_v43 = vmax.f32 %v1262_v39, 0.0 }
 0x488   :  { %v1391_v40 = vmax.f32 %v1273_v34, 0.0 }
 0x489   :  { %v1389_v27 = vmax.f32 %v1265_v52, 0.0 }
 0x48a   :  { %v1766_v17 = vpack.c.bf16 %v1391_v40, %v1390_v38 }
 0x48b   :  { %v1761_v3 = vpack.c.bf16 %v1389_v27, %v1388_v43  ;;  %v2178_v16 = vpop.f32.mrb[36].mxu0 }
 0x48c   :  { %1853 = vst [vmem:[#allocation8 + $0x8] sm:$0xff] %v1766_v17   ;;  %v1286_v61 = vadd.f32 %v2178_v16, %v2752_v51  ;;  %v1277_v55 = vpop.f32.mrb[37].mxu0 }
 0x48d   :  { %1762 = vst [vmem:[#allocation8] sm:$0xff] %v1761_v3   ;;  %v1278_v11 = vadd.f32 %v1277_v55, %v2752_v51  ;;  %v2179_v24 = vpop.f32.mrb[38].mxu0 }
 0x48e   :  { %v1289_v44 = vadd.f32 %v2179_v24, %v2752_v51  ;;  %v1280_v14 = vpop.f32.mrb[39].mxu0  ;;  %v1394_v28 = vmax.f32 %v1286_v61, 0.0 }
 0x48f   :  { %v1281_v36 = vadd.f32 %v1280_v14, %v2752_v51  ;;  %v1392_v45 = vmax.f32 %v1278_v11, 0.0 }
 0x490   :  { %v1395_v20 = vmax.f32 %v1289_v44, 0.0 }
 0x491   :  { %v1393_v21 = vmax.f32 %v1281_v36, 0.0 }
 0x492   :  { %v1776_v59 = vpack.c.bf16 %v1395_v20, %v1394_v28 }
 0x493   :  { %v1771_v37 = vpack.c.bf16 %v1393_v21, %v1392_v45  ;;  %v2182_v56 = vpop.f32.mrb[40].mxu0 }
 0x494   :  { %1855 = vst [vmem:[#allocation8 + $0x18] sm:$0xff] %v1776_v59   ;;  %v1302_v60 = vadd.f32 %v2182_v56, %v2752_v51  ;;  %v1293_v57 = vpop.f32.mrb[41].mxu0 }
 0x495   :  { %1854 = vst [vmem:[#allocation8 + $0x10] sm:$0xff] %v1771_v37   ;;  %v1294_v48 = vadd.f32 %v1293_v57, %v2752_v51  ;;  %v2183_v2 = vpop.f32.mrb[42].mxu0 }
 0x496   :  { %v1305_v49 = vadd.f32 %v2183_v2, %v2752_v51  ;;  %v1296_v5 = vpop.f32.mrb[43].mxu0  ;;  %v1398_v62 = vmax.f32 %v1302_v60, 0.0 }
 0x497   :  { %v1297_v32 = vadd.f32 %v1296_v5, %v2752_v51  ;;  %v1396_v33 = vmax.f32 %v1294_v48, 0.0 }
 0x498   :  { %v1399_v4 = vmax.f32 %v1305_v49, 0.0 }
 0x499   :  { %v1397_v50 = vmax.f32 %v1297_v32, 0.0 }
 0x49a   :  { %v1786_v6 = vpack.c.bf16 %v1399_v4, %v1398_v62 }
 0x49b   :  { %v1781_v53 = vpack.c.bf16 %v1397_v50, %v1396_v33  ;;  %v2186_v7 = vpop.f32.mrb[44].mxu0 }
 0x49c   :  { %1857 = vst [vmem:[#allocation8 + $0x28] sm:$0xff] %v1786_v6   ;;  %v1318_v54 = vadd.f32 %v2186_v7, %v2752_v51  ;;  %v1309_v58 = vpop.f32.mrb[45].mxu0 }
 0x49d   :  { %1856 = vst [vmem:[#allocation8 + $0x20] sm:$0xff] %v1781_v53   ;;  %v1310_v13 = vadd.f32 %v1309_v58, %v2752_v51  ;;  %v2187_v12 = vpop.f32.mrb[46].mxu0 }
 0x49e   :  { %v1321_v63 = vadd.f32 %v2187_v12, %v2752_v51  ;;  %v1312_v0 = vpop.f32.mrb[47].mxu0  ;;  %v1402_v1 = vmax.f32 %v1318_v54, 0.0 }
 0x49f   :  { %v1313_v8 = vadd.f32 %v1312_v0, %v2752_v51  ;;  %v1400_v42 = vmax.f32 %v1310_v13, 0.0 }
 0x4a0   :  { %v1403_v41 = vmax.f32 %v1321_v63, 0.0 }
 0x4a1   :  { %v1401_v10 = vmax.f32 %v1313_v8, 0.0 }
 0x4a2   :  { %v1796_v9 = vpack.c.bf16 %v1403_v41, %v1402_v1 }
 0x4a3   :  { %v1791_v15 = vpack.c.bf16 %v1401_v10, %v1400_v42  ;;  %v2190_v18 = vpop.f32.mrb[48].mxu0 }
 0x4a4   :  { %1859 = vst [vmem:[#allocation8 + $0x38] sm:$0xff] %v1796_v9   ;;  %v1334_v19 = vadd.f32 %v2190_v18, %v2752_v51  ;;  %v1325_v26 = vpop.f32.mrb[49].mxu0 }
 0x4a5   :  { %1858 = vst [vmem:[#allocation8 + $0x30] sm:$0xff] %v1791_v15   ;;  %v1326_v46 = vadd.f32 %v1325_v26, %v2752_v51  ;;  %v2191_v47 = vpop.f32.mrb[50].mxu0 }
 0x4a6   :  { %v1337_v25 = vadd.f32 %v2191_v47, %v2752_v51  ;;  %v1328_v29 = vpop.f32.mrb[51].mxu0  ;;  %v1406_v22 = vmax.f32 %v1334_v19, 0.0 }
 0x4a7   :  { %v1329_v30 = vadd.f32 %v1328_v29, %v2752_v51  ;;  %v1404_v39 = vmax.f32 %v1326_v46, 0.0 }
 0x4a8   :  { %v1407_v31 = vmax.f32 %v1337_v25, 0.0 }
 0x4a9   :  { %v1405_v23 = vmax.f32 %v1329_v30, 0.0 }
 0x4aa   :  { %v1806_v34 = vpack.c.bf16 %v1407_v31, %v1406_v22 }
 0x4ab   :  { %v1801_v35 = vpack.c.bf16 %v1405_v23, %v1404_v39  ;;  %v2194_v52 = vpop.f32.mrb[52].mxu0 }
 0x4ac   :  { %1861 = vst [vmem:[#allocation8 + $0x48] sm:$0xff] %v1806_v34   ;;  %v1350_v38 = vadd.f32 %v2194_v52, %v2752_v51  ;;  %v1341_v40 = vpop.f32.mrb[53].mxu0 }
 0x4ad   :  { %1860 = vst [vmem:[#allocation8 + $0x40] sm:$0xff] %v1801_v35   ;;  %v1342_v43 = vadd.f32 %v1341_v40, %v2752_v51  ;;  %v2195_v27 = vpop.f32.mrb[54].mxu0 }
 0x4ae   :  { %v1353_v17 = vadd.f32 %v2195_v27, %v2752_v51  ;;  %v1344_v3 = vpop.f32.mrb[55].mxu0  ;;  %v1410_v61 = vmax.f32 %v1350_v38, 0.0 }
 0x4af   :  { %v1345_v16 = vadd.f32 %v1344_v3, %v2752_v51  ;;  %v1408_v11 = vmax.f32 %v1342_v43, 0.0 }
 0x4b0   :  { %v1411_v55 = vmax.f32 %v1353_v17, 0.0 }
 0x4b1   :  { %v1409_v24 = vmax.f32 %v1345_v16, 0.0 }
 0x4b2   :  { %v1816_v44 = vpack.c.bf16 %v1411_v55, %v1410_v61 }
 0x4b3   :  { %v1811_v14 = vpack.c.bf16 %v1409_v24, %v1408_v11  ;;  %v2198_v36 = vpop.f32.mrb[56].mxu0 }
 0x4b4   :  { %1863 = vst [vmem:[#allocation8 + $0x58] sm:$0xff] %v1816_v44   ;;  %v1366_v28 = vadd.f32 %v2198_v36, %v2752_v51  ;;  %v1357_v20 = vpop.f32.mrb[57].mxu0 }
 0x4b5   :  { %1862 = vst [vmem:[#allocation8 + $0x50] sm:$0xff] %v1811_v14   ;;  %v1358_v45 = vadd.f32 %v1357_v20, %v2752_v51  ;;  %v2199_v21 = vpop.f32.mrb[58].mxu0 }
 0x4b6   :  { %v1369_v59 = vadd.f32 %v2199_v21, %v2752_v51  ;;  %v1360_v37 = vpop.f32.mrb[59].mxu0  ;;  %v1414_v60 = vmax.f32 %v1366_v28, 0.0 }
 0x4b7   :  { %v1361_v56 = vadd.f32 %v1360_v37, %v2752_v51  ;;  %v1412_v48 = vmax.f32 %v1358_v45, 0.0 }
 0x4b8   :  { %v1415_v57 = vmax.f32 %v1369_v59, 0.0 }
 0x4b9   :  { %v1413_v2 = vmax.f32 %v1361_v56, 0.0 }
 0x4ba   :  { %v1826_v49 = vpack.c.bf16 %v1415_v57, %v1414_v60 }
 0x4bb   :  { %v1821_v5 = vpack.c.bf16 %v1413_v2, %v1412_v48  ;;  %v2202_v32 = vpop.f32.mrb[60].mxu0 }
 0x4bc   :  { %1865 = vst [vmem:[#allocation8 + $0x68] sm:$0xff] %v1826_v49   ;;  %v1382_v62 = vadd.f32 %v2202_v32, %v2752_v51  ;;  %v1373_v4 = vpop.f32.mrb[61].mxu0 }
 0x4bd   :  { %1864 = vst [vmem:[#allocation8 + $0x60] sm:$0xff] %v1821_v5   ;;  %v1374_v33 = vadd.f32 %v1373_v4, %v2752_v51  ;;  %v2203_v50 = vpop.f32.mrb[62].mxu0 }
 0x4be   :  { %v1385_v6 = vadd.f32 %v2203_v50, %v2752_v51  ;;  %v1376_v53 = vpop.f32.mrb[63].mxu0  ;;  %v1418_v54 = vmax.f32 %v1382_v62, 0.0 }
 0x4bf   :  { %v1377_v7 = vadd.f32 %v1376_v53, %v2752_v51  ;;  %v1416_v13 = vmax.f32 %v1374_v33, 0.0 }
 0x4c0   :  { %v1419_v58 = vmax.f32 %v1385_v6, 0.0 }
 0x4c1   :  { %v1417_v12 = vmax.f32 %v1377_v7, 0.0 }
 0x4c2   :  { %v1836_v63 = vpack.c.bf16 %v1419_v58, %v1418_v54 }
 0x4c3   :  { %v1831_v0 = vpack.c.bf16 %v1417_v12, %v1416_v13 }
 0x4c4   :  { %1867 = vst [vmem:[#allocation8 + $0x78] sm:$0xff] %v1836_v63  }
 0x4c5   :  { %1866 = vst [vmem:[#allocation8 + $0x70] sm:$0xff] %v1831_v0  }
 0x4c6   :  { %2383 = shalt.err (!%p2380_p0)
}
 0x4c7   :  { %s2384_s6 = scalar_lea.hbm %s2805_s4, 2048 }
 0x4c8   :  { %p2385_p1 = scmp.ne.s32.totalorder %s2805_s4, %s2384_s6  ;;  %p2388_p2 = scmp.lt.u32.totalorder %s2384_s6, %s2805_s4 }
 0x4ca   :  { %p2390_p3 = pnand %p2388_p2, %p2385_p1 }
 0x4cc   :  { %2393 = shalt.err (!%p2390_p3)
}
 0x4cd   :  { %1591 = dma.vmem_to_hbm [thread:$0]  %s1586_s26, 2048, %s2805_s4, [#allocation4], %s2402_s27, %s2402_s27, %s2403_s28  }
 0x4ce   :  { %2398 = dma.done.wait [#allocation4], 2048  }
 0x4cf   :  { %2399 = vsyncadd [#allocation4], 4294965248 }
 0x4d0   :  { %1595 = vsyncpa [#allocation3], 1 }
 0x4d1   :  { %1596 = vsyncpa [#allocation6], 1 }
 0x4d2   :  { %1597 = vsyncpa [#allocation4], 1 }

</bundles_post_ra>
